<compile_context>
chip_gen: v5e
topology: v5e:2x2
jax: 0.10.0
libtpu: 0.0.40
codegen_flags: <defaults>
</compile_context>

<pallas_src>
import functools

import jax
import jax.numpy as jnp
from jax import lax
from jax.experimental import pallas as pl
from jax.experimental.pallas import tpu as pltpu


def _sigmoid(x):
    # sigmoid(x) == 0.5*(tanh(0.5*x)+1): one EUP tanh instead of exp+div.
    return 0.5 * (jnp.tanh(0.5 * x) + 1.0)


def _largest_divisor_leq(n, cap, prefer_multiple_of=1):
    """Largest divisor of n that is <= cap, preferring multiples of
    `prefer_multiple_of` (for (8,128)-friendly tiles)."""
    if n <= cap:
        return n
    fallback = 1
    for c in range(min(n, cap), 0, -1):
        if n % c == 0:
            if c % prefer_multiple_of == 0:
                return c
            if fallback == 1:
                fallback = c
    return fallback


# -----------------------------------------------------------------------------
# Kernel 1: fused bidirectional LSTM layer (recurrent part only).
# Grid = (direction, time-chunk).  Gate pre-activations from the input
# projection (gx) are precomputed outside; inside we only do h @ Whh per step.
# h/c are carried in VMEM scratch across time chunks (reset at chunk 0).
# -----------------------------------------------------------------------------
def _bilstm_kernel(gx_ref, whh_ref, out_ref, h_scr, c_scr, *, unroll):
    d = pl.program_id(0)                       # 0 = forward, 1 = reverse

    @pl.when(pl.program_id(1) == 0)
    def _():
        h_scr[...] = jnp.zeros_like(h_scr)
        c_scr[...] = jnp.zeros_like(c_scr)

    Tc = gx_ref.shape[0]
    H = h_scr.shape[1]
    whh = whh_ref[...]                         # (H, 4H) bf16, resident

    def step(s, carry):
        h, c = carry
        # forward walks s = 0..Tc-1, reverse walks Tc-1..0 within the chunk.
        lt = s + d * (Tc - 1 - 2 * s)
        gates = gx_ref[lt] + jnp.dot(h.astype(jnp.bfloat16), whh,
                                     preferred_element_type=jnp.float32)
        i_g = _sigmoid(gates[:, 0 * H:1 * H])  # PyTorch gate order i, f, g, o
        f_g = _sigmoid(gates[:, 1 * H:2 * H])
        g_g = jnp.tanh(gates[:, 2 * H:3 * H])
        o_g = _sigmoid(gates[:, 3 * H:4 * H])
        c_new = f_g * c + i_g * g_g
        h_new = o_g * jnp.tanh(c_new)
        out_ref[lt] = h_new
        return h_new, c_new

    h, c = lax.fori_loop(0, Tc, step, (h_scr[...], c_scr[...]), unroll=unroll)
    h_scr[...] = h
    c_scr[...] = c


def bilstm_layer(layer_in, wih_stack, whh_stack, bias_stack, *, time_chunk=128):
    """One fused bidirectional LSTM layer.

    layer_in  : (P, T, B, Dp) previous per-direction outputs (P=1 for the raw
                input; P=2 afterwards -- the [fwd|rev] feature concat is never
                materialized).
    wih_stack : (2, P, Dp, 4H) transposed / split input-projection weights.
    whh_stack : (2, H, 4H)     transposed recurrent weights.
    bias_stack: (2, 4H)        b_ih + b_hh per direction.
    returns (2, T, B, H) hidden sequences in natural time order.
    """
    P, T, B, Dp = layer_in.shape
    H = whh_stack.shape[1]

    # -- hoisted input projection: one big MXU-friendly GEMM (XLA, bf16/f32) --
    gx = jnp.einsum("ptbd,zpdg->ztbg",
                    layer_in.astype(jnp.bfloat16),
                    wih_stack.astype(jnp.bfloat16),
                    preferred_element_type=jnp.float32)
    gx = gx + bias_stack[:, None, None, :]     # (2, T, B, 4H) f32

    Tc = _largest_divisor_leq(T, time_chunk)
    nc = T // Tc

    def seq_idx(dd, cc):
        # forward consumes chunks 0..nc-1, reverse consumes nc-1..0.
        return cc + dd * (nc - 1 - 2 * cc)

    if Tc <= 16:
        unroll = True
    elif Tc % 8 == 0:
        unroll = 8
    else:
        unroll = 1
    kernel = functools.partial(_bilstm_kernel, unroll=unroll)

    return pl.pallas_call(
        kernel,
        out_shape=jax.ShapeDtypeStruct((2, T, B, H), jnp.float32),
        grid_spec=pltpu.PrefetchScalarGridSpec(
            num_scalar_prefetch=0,
            grid=(2, nc),                      # (direction, time-chunk)
            in_specs=[
                pl.BlockSpec((None, Tc, B, 4 * H),
                             lambda dd, cc: (dd, seq_idx(dd, cc), 0, 0)),
                pl.BlockSpec((None, H, 4 * H),
                             lambda dd, cc: (dd, 0, 0)),
            ],
            out_specs=pl.BlockSpec((None, Tc, B, H),
                                   lambda dd, cc: (dd, seq_idx(dd, cc), 0, 0)),
            scratch_shapes=[
                pltpu.VMEM((B, H), jnp.float32),   # h carry (f32)
                pltpu.VMEM((B, H), jnp.float32),   # c carry (f32)
            ],
        ),
        compiler_params=pltpu.CompilerParams(
            # direction axis -> the two TensorCores on v7x; time chunks are
            # sequential because of the carried h/c state.
            dimension_semantics=("parallel", "arbitrary")),
    )(gx, whh_stack.astype(jnp.bfloat16))


# -----------------------------------------------------------------------------
# Kernel 2: additive attention + dense head (leaky_relu MLP + sigmoid output).
# Tiled over batch; scores kept as (Bt, T) with T on the lane axis.
# -----------------------------------------------------------------------------
def _make_head_kernel(depth, slope=0.01):
    def kernel(*refs):
        lstm_ref, w_att_ref, b_att_ref, u_ref = refs[0:4]
        dense_refs = refs[4:4 + 2 * depth]
        wo_ref, bo_ref, out_ref = refs[4 + 2 * depth:]

        x = lstm_ref[...]                      # (Bt, T, 2H) f32
        Bt, T, H2 = x.shape
        A = u_ref.shape[-1]

        # attention_input = tanh(lstm_out @ W_att + b_att)   (bf16 MXU, f32 acc)
        att_in = jnp.tanh(
            jnp.dot(x.reshape(Bt * T, H2).astype(jnp.bfloat16), w_att_ref[...],
                    preferred_element_type=jnp.float32) + b_att_ref[...])
        att_in = att_in.reshape(Bt, T, A)      # leading-dim split (no relayout)
        # scores laid out (Bt, T): lane reduction over A, softmax over lanes.
        scores = jnp.sum(att_in * u_ref[...], axis=-1)      # (Bt, T)
        m = jnp.max(scores, axis=-1, keepdims=True)
        e = jnp.exp(scores - m)
        att_w = e * pl.reciprocal(jnp.sum(e, axis=-1, keepdims=True))
        # context = sum_t w[b,t] * lstm_out[b,t,:] as one batched MXU matmul.
        ctx = jnp.einsum("bqt,btd->bqd", att_w[:, None, :], x,
                         preferred_element_type=jnp.float32)[:, 0, :]

        h = ctx
        for d in range(depth):
            w_ref = dense_refs[2 * d]
            b_ref = dense_refs[2 * d + 1]
            z = jnp.dot(h, w_ref[...],
                        preferred_element_type=jnp.float32) + b_ref[...]
            h = jnp.where(z >= 0, z, slope * z)   # leaky_relu; dropout=identity
        logits = jnp.dot(h, wo_ref[...],
                         preferred_element_type=jnp.float32) + bo_ref[...]
        out_ref[...] = _sigmoid(logits)

    return kernel


def attention_dense_head(lstm_out, params, depth, *, batch_tile=128):
    B, T, H2 = lstm_out.shape
    C = params["w_out"].shape[1]
    # batch tile: keep VMEM bounded; prefer multiples of 8 for clean tiling.
    bt = _largest_divisor_leq(B, batch_tile, prefer_multiple_of=8)

    def wspec(shape):
        n = len(shape)
        return pl.BlockSpec(shape, lambda i, _n=n: (0,) * _n)

    args = [lstm_out,
            params["w_att"].astype(jnp.bfloat16),
            params["b_att"], params["u_att"]]
    for d in range(depth):
        args += [params[f"w_dense{d}"], params[f"b_dense{d}"]]
    args += [params["w_out"], params["b_out"]]

    in_specs = [pl.BlockSpec((bt, T, H2), lambda i: (i, 0, 0))]
    in_specs += [wspec(a.shape) for a in args[1:]]

    return pl.pallas_call(
        _make_head_kernel(depth),
        out_shape=jax.ShapeDtypeStruct((B, C), jnp.float32),
        grid_spec=pltpu.PrefetchScalarGridSpec(
            num_scalar_prefetch=0,
            grid=(B // bt,),
            in_specs=in_specs,
            out_specs=pl.BlockSpec((bt, C), lambda i: (i, 0)),
        ),
        compiler_params=pltpu.CompilerParams(
            dimension_semantics=("parallel",)),
    )(*args)


# -----------------------------------------------------------------------------
# Full LSTMv2 forward
# -----------------------------------------------------------------------------
def lstmv2_forward(x, params, *, num_layers, hidden_size, depth):
    """x: (B, T, input_size) float32 -> (B, num_classes) float32."""
    B, T, _ = x.shape
    H = hidden_size
    layer_in = jnp.transpose(x, (1, 0, 2))[None]    # (P=1, T, B, Din)

    for layer in range(num_layers):
        P = layer_in.shape[0]
        Dp = layer_in.shape[-1]
        wih, whh, bias = [], [], []
        for tag in ("", "_reverse"):
            w_ih = params[f"weight_ih_l{layer}{tag}"]       # (4H, P*Dp)
            wih.append(jnp.transpose(w_ih).reshape(P, Dp, 4 * H))
            whh.append(jnp.transpose(params[f"weight_hh_l{layer}{tag}"]))
            bias.append(params[f"bias_ih_l{layer}{tag}"]
                        + params[f"bias_hh_l{layer}{tag}"])
        layer_in = bilstm_layer(layer_in, jnp.stack(wih), jnp.stack(whh),
                                jnp.stack(bias))             # (2, T, B, H)

    # (2, T, B, H) -> (B, T, 2H), [forward | reverse] feature order (PyTorch).
    lstm_out = jnp.transpose(layer_in, (2, 1, 0, 3)).reshape(B, T, 2 * H)
    # TODO(synk): dropout layers (dropout_lstm / dropout_layers) are identity
    # in eval mode and intentionally not implemented.
    return attention_dense_head(lstm_out, params, depth)


# -----------------------------------------------------------------------------
# Deterministic parameter construction (shapes follow the PyTorch __init__)
# -----------------------------------------------------------------------------
def init_params(key, *, input_size, hidden_size, num_layers, depth, width,
                num_classes, attention_dim):
    params = {}
    k = 1.0 / jnp.sqrt(hidden_size)

    def nxt():
        nonlocal key
        key, sub = jax.random.split(key)
        return sub

    def uni(shape, scale):
        return jax.random.uniform(nxt(), shape, jnp.float32, -scale, scale)

    for layer in range(num_layers):
        in_dim = input_size if layer == 0 else 2 * hidden_size
        for tag in ("", "_reverse"):
            params[f"weight_ih_l{layer}{tag}"] = uni((4 * hidden_size, in_dim), k)
            params[f"weight_hh_l{layer}{tag}"] = uni((4 * hidden_size, hidden_size), k)
            params[f"bias_ih_l{layer}{tag}"] = uni((4 * hidden_size,), k)
            params[f"bias_hh_l{layer}{tag}"] = uni((4 * hidden_size,), k)

    h2 = 2 * hidden_size
    # attention: Linear(2H, A) + Linear(A, 1, bias=False); stored transposed.
    params["w_att"] = uni((h2, attention_dim), 1.0 / jnp.sqrt(h2))
    params["b_att"] = uni((1, attention_dim), 1.0 / jnp.sqrt(h2))
    params["u_att"] = uni((1, attention_dim), 1.0 / jnp.sqrt(attention_dim))

    prev = h2
    for d in range(depth):
        params[f"w_dense{d}"] = uni((prev, width), 1.0 / jnp.sqrt(prev))
        params[f"b_dense{d}"] = uni((1, width), 1.0 / jnp.sqrt(prev))
        prev = width

    params["w_out"] = uni((width, num_classes), 1.0 / jnp.sqrt(width))
    params["b_out"] = uni((1, num_classes), 1.0 / jnp.sqrt(width))
    return params


if __name__ == "__main__":
    # Small, forward-consistent shapes.
    input_size = 4
    hidden_size = 32
    num_layers = 2
    depth = 2
    width = 16
    num_classes = 3
    attention_dim = 6
    batch, seq = 2, 8

    key = jax.random.PRNGKey(0)
    key, pkey, xkey = jax.random.split(key, 3)

    params = init_params(pkey, input_size=input_size, hidden_size=hidden_size,
                         num_layers=num_layers, depth=depth, width=width,
                         num_classes=num_classes, attention_dim=attention_dim)

    x = jax.random.normal(xkey, (batch, seq, input_size), jnp.float32)

    fwd = jax.jit(functools.partial(lstmv2_forward, num_layers=num_layers,
                                    hidden_size=hidden_size, depth=depth))
    out = fwd(x, params)
    jax.block_until_ready(out)

    assert out.shape == (batch, num_classes)
    assert bool(jnp.all(jnp.isfinite(out)))
    assert bool(jnp.all((out >= 0.0) & (out <= 1.0)))   # sigmoid output range
    print("KERNEL_OK")
</pallas_src>

<mosaic_0001>
module attributes {stable_mosaic.version = 11 : i64} {
  func.func @_bilstm_kernel(%arg0: i32, %arg1: i32, %arg2: memref<1x8x2x128xf32, #tpu.memory_space<vmem>>, %arg3: memref<1x32x128xbf16, #tpu.memory_space<vmem>>, %arg4: memref<1x8x2x32xf32, #tpu.memory_space<vmem>>, %arg5: memref<2x32xf32, #tpu.memory_space<vmem>>, %arg6: memref<2x32xf32, #tpu.memory_space<vmem>>) attributes {dimension_semantics = [#tpu.dimension_semantics<parallel>, #tpu.dimension_semantics<arbitrary>], iteration_bounds = array<i64: 2, 1>, scalar_prefetch = 0 : i64, scratch_operands = 2 : i64, tpu.core_type = #tpu.core_type<tc>, window_params = [{transform_indices = @transform_0, window_bounds = array<i64: 1, 8, 2, 128>}, {transform_indices = @transform_1, window_bounds = array<i64: 1, 32, 128>}, {transform_indices = @transform_2, window_bounds = array<i64: 1, 8, 2, 32>}]} {
    %c0_i32 = arith.constant 0 : i32
    %0 = arith.cmpi eq, %arg1, %c0_i32 : i32
    %1 = arith.extui %0 : i1 to i32
    %c0_i32_0 = arith.constant 0 : i32
    %2 = arith.cmpi ne, %1, %c0_i32_0 : i32
    scf.if %2 {
      %cst_155 = arith.constant 0.000000e+00 : f32
      %369 = vector.broadcast %cst_155 : f32 to vector<2x32xf32>
      %c0_156 = arith.constant 0 : index
      %c0_157 = arith.constant 0 : index
      %370 = vector.load %arg5[%c0_156, %c0_157] : memref<2x32xf32, #tpu.memory_space<vmem>>, vector<2x32xf32>
      tpu.vector_store %arg5[%c0_156, %c0_157], %369 {strides = array<i32>} : memref<2x32xf32, #tpu.memory_space<vmem>>, vector<2x32xf32>,
      %cst_158 = arith.constant 0.000000e+00 : f32
      %371 = vector.broadcast %cst_158 : f32 to vector<2x32xf32>
      %c0_159 = arith.constant 0 : index
      %c0_160 = arith.constant 0 : index
      %372 = vector.load %arg6[%c0_159, %c0_160] : memref<2x32xf32, #tpu.memory_space<vmem>>, vector<2x32xf32>
      tpu.vector_store %arg6[%c0_159, %c0_160], %371 {strides = array<i32>} : memref<2x32xf32, #tpu.memory_space<vmem>>, vector<2x32xf32>,
    } else {
    }
    %c0 = arith.constant 0 : index
    %c0_1 = arith.constant 0 : index
    %c0_2 = arith.constant 0 : index
    %3 = vector.load %arg3[%c0, %c0_1, %c0_2] : memref<1x32x128xbf16, #tpu.memory_space<vmem>>, vector<1x32x128xbf16>
    %4 = vector.shape_cast %3 : vector<1x32x128xbf16> to vector<32x128xbf16>
    %c0_3 = arith.constant 0 : index
    %c0_4 = arith.constant 0 : index
    %5 = vector.load %arg5[%c0_3, %c0_4] : memref<2x32xf32, #tpu.memory_space<vmem>>, vector<2x32xf32>
    %c0_5 = arith.constant 0 : index
    %c0_6 = arith.constant 0 : index
    %6 = vector.load %arg6[%c0_5, %c0_6] : memref<2x32xf32, #tpu.memory_space<vmem>>, vector<2x32xf32>
    %c0_i32_7 = arith.constant 0 : i32
    %c2_i32 = arith.constant 2 : i32
    %7 = arith.muli %c2_i32, %c0_i32_7 : i32
    %c7_i32 = arith.constant 7 : i32
    %8 = arith.subi %c7_i32, %7 : i32
    %9 = arith.muli %arg0, %8 : i32
    %10 = arith.addi %c0_i32_7, %9 : i32
    %c0_8 = arith.constant 0 : index
    %11 = arith.index_cast %10 : i32 to index
    %c0_9 = arith.constant 0 : index
    %c0_10 = arith.constant 0 : index
    %12 = vector.load %arg2[%c0_8, %11, %c0_9, %c0_10] : memref<1x8x2x128xf32, #tpu.memory_space<vmem>>, vector<1x1x2x128xf32>
    %13 = vector.shape_cast %12 : vector<1x1x2x128xf32> to vector<2x128xf32>
    %14 = arith.truncf %5 : vector<2x32xf32> to vector<2x32xbf16>
    %cst = arith.constant dense<0.000000e+00> : vector<2x128xf32>
    %15 = tpu.matmul %14, %4, %cst {dimension_numbers = #tpu.dot_dimension_numbers<[1], [0], [0], [1], [0, 0, 1, 1], [], []>} : vector<2x32xbf16>, vector<32x128xbf16>, vector<2x128xf32> -> vector<2x128xf32>
    %16 = arith.addf %13, %15 : vector<2x128xf32>
    %17 = vector.extract_strided_slice %16 {offsets = [0, 0], sizes = [2, 32], strides = [1, 1]} : vector<2x128xf32> to vector<2x32xf32>
    %cst_11 = arith.constant 5.000000e-01 : f32
    %18 = vector.broadcast %cst_11 : f32 to vector<2x32xf32>
    %19 = arith.mulf %18, %17 : vector<2x32xf32>
    %20 = math.tanh %19 : vector<2x32xf32>
    %cst_12 = arith.constant 1.000000e+00 : f32
    %21 = vector.broadcast %cst_12 : f32 to vector<2x32xf32>
    %22 = arith.addf %20, %21 : vector<2x32xf32>
    %cst_13 = arith.constant 5.000000e-01 : f32
    %23 = vector.broadcast %cst_13 : f32 to vector<2x32xf32>
    %24 = arith.mulf %23, %22 : vector<2x32xf32>
    %25 = vector.extract_strided_slice %16 {offsets = [0, 32], sizes = [2, 32], strides = [1, 1]} : vector<2x128xf32> to vector<2x32xf32>
    %cst_14 = arith.constant 5.000000e-01 : f32
    %26 = vector.broadcast %cst_14 : f32 to vector<2x32xf32>
    %27 = arith.mulf %26, %25 : vector<2x32xf32>
    %28 = math.tanh %27 : vector<2x32xf32>
    %cst_15 = arith.constant 1.000000e+00 : f32
    %29 = vector.broadcast %cst_15 : f32 to vector<2x32xf32>
    %30 = arith.addf %28, %29 : vector<2x32xf32>
    %cst_16 = arith.constant 5.000000e-01 : f32
    %31 = vector.broadcast %cst_16 : f32 to vector<2x32xf32>
    %32 = arith.mulf %31, %30 : vector<2x32xf32>
    %33 = vector.extract_strided_slice %16 {offsets = [0, 64], sizes = [2, 32], strides = [1, 1]} : vector<2x128xf32> to vector<2x32xf32>
    %34 = math.tanh %33 : vector<2x32xf32>
    %35 = vector.extract_strided_slice %16 {offsets = [0, 96], sizes = [2, 32], strides = [1, 1]} : vector<2x128xf32> to vector<2x32xf32>
    %cst_17 = arith.constant 5.000000e-01 : f32
    %36 = vector.broadcast %cst_17 : f32 to vector<2x32xf32>
    %37 = arith.mulf %36, %35 : vector<2x32xf32>
    %38 = math.tanh %37 : vector<2x32xf32>
    %cst_18 = arith.constant 1.000000e+00 : f32
    %39 = vector.broadcast %cst_18 : f32 to vector<2x32xf32>
    %40 = arith.addf %38, %39 : vector<2x32xf32>
    %cst_19 = arith.constant 5.000000e-01 : f32
    %41 = vector.broadcast %cst_19 : f32 to vector<2x32xf32>
    %42 = arith.mulf %41, %40 : vector<2x32xf32>
    %43 = arith.mulf %32, %6 : vector<2x32xf32>
    %44 = arith.mulf %24, %34 : vector<2x32xf32>
    %45 = arith.addf %43, %44 : vector<2x32xf32>
    %46 = math.tanh %45 : vector<2x32xf32>
    %47 = arith.mulf %42, %46 : vector<2x32xf32>
    %c0_20 = arith.constant 0 : index
    %48 = arith.index_cast %10 : i32 to index
    %c0_21 = arith.constant 0 : index
    %c0_22 = arith.constant 0 : index
    %49 = vector.load %arg4[%c0_20, %48, %c0_21, %c0_22] : memref<1x8x2x32xf32, #tpu.memory_space<vmem>>, vector<1x1x2x32xf32>
    %50 = vector.shape_cast %49 : vector<1x1x2x32xf32> to vector<2x32xf32>
    %51 = vector.shape_cast %47 : vector<2x32xf32> to vector<1x1x2x32xf32>
    tpu.vector_store %arg4[%c0_20, %48, %c0_21, %c0_22], %51 {strides = array<i32>} : memref<1x8x2x32xf32, #tpu.memory_space<vmem>>, vector<1x1x2x32xf32>,
    %c1_i32 = arith.constant 1 : i32
    %c2_i32_23 = arith.constant 2 : i32
    %52 = arith.muli %c2_i32_23, %c1_i32 : i32
    %c7_i32_24 = arith.constant 7 : i32
    %53 = arith.subi %c7_i32_24, %52 : i32
    %54 = arith.muli %arg0, %53 : i32
    %55 = arith.addi %c1_i32, %54 : i32
    %c0_25 = arith.constant 0 : index
    %56 = arith.index_cast %55 : i32 to index
    %c0_26 = arith.constant 0 : index
    %c0_27 = arith.constant 0 : index
    %57 = vector.load %arg2[%c0_25, %56, %c0_26, %c0_27] : memref<1x8x2x128xf32, #tpu.memory_space<vmem>>, vector<1x1x2x128xf32>
    %58 = vector.shape_cast %57 : vector<1x1x2x128xf32> to vector<2x128xf32>
    %59 = arith.truncf %47 : vector<2x32xf32> to vector<2x32xbf16>
    %cst_28 = arith.constant dense<0.000000e+00> : vector<2x128xf32>
    %60 = tpu.matmul %59, %4, %cst_28 {dimension_numbers = #tpu.dot_dimension_numbers<[1], [0], [0], [1], [0, 0, 1, 1], [], []>} : vector<2x32xbf16>, vector<32x128xbf16>, vector<2x128xf32> -> vector<2x128xf32>
    %61 = arith.addf %58, %60 : vector<2x128xf32>
    %62 = vector.extract_strided_slice %61 {offsets = [0, 0], sizes = [2, 32], strides = [1, 1]} : vector<2x128xf32> to vector<2x32xf32>
    %cst_29 = arith.constant 5.000000e-01 : f32
    %63 = vector.broadcast %cst_29 : f32 to vector<2x32xf32>
    %64 = arith.mulf %63, %62 : vector<2x32xf32>
    %65 = math.tanh %64 : vector<2x32xf32>
    %cst_30 = arith.constant 1.000000e+00 : f32
    %66 = vector.broadcast %cst_30 : f32 to vector<2x32xf32>
    %67 = arith.addf %65, %66 : vector<2x32xf32>
    %cst_31 = arith.constant 5.000000e-01 : f32
    %68 = vector.broadcast %cst_31 : f32 to vector<2x32xf32>
    %69 = arith.mulf %68, %67 : vector<2x32xf32>
    %70 = vector.extract_strided_slice %61 {offsets = [0, 32], sizes = [2, 32], strides = [1, 1]} : vector<2x128xf32> to vector<2x32xf32>
    %cst_32 = arith.constant 5.000000e-01 : f32
    %71 = vector.broadcast %cst_32 : f32 to vector<2x32xf32>
    %72 = arith.mulf %71, %70 : vector<2x32xf32>
    %73 = math.tanh %72 : vector<2x32xf32>
    %cst_33 = arith.constant 1.000000e+00 : f32
    %74 = vector.broadcast %cst_33 : f32 to vector<2x32xf32>
    %75 = arith.addf %73, %74 : vector<2x32xf32>
    %cst_34 = arith.constant 5.000000e-01 : f32
    %76 = vector.broadcast %cst_34 : f32 to vector<2x32xf32>
    %77 = arith.mulf %76, %75 : vector<2x32xf32>
    %78 = vector.extract_strided_slice %61 {offsets = [0, 64], sizes = [2, 32], strides = [1, 1]} : vector<2x128xf32> to vector<2x32xf32>
    %79 = math.tanh %78 : vector<2x32xf32>
    %80 = vector.extract_strided_slice %61 {offsets = [0, 96], sizes = [2, 32], strides = [1, 1]} : vector<2x128xf32> to vector<2x32xf32>
    %cst_35 = arith.constant 5.000000e-01 : f32
    %81 = vector.broadcast %cst_35 : f32 to vector<2x32xf32>
    %82 = arith.mulf %81, %80 : vector<2x32xf32>
    %83 = math.tanh %82 : vector<2x32xf32>
    %cst_36 = arith.constant 1.000000e+00 : f32
    %84 = vector.broadcast %cst_36 : f32 to vector<2x32xf32>
    %85 = arith.addf %83, %84 : vector<2x32xf32>
    %cst_37 = arith.constant 5.000000e-01 : f32
    %86 = vector.broadcast %cst_37 : f32 to vector<2x32xf32>
    %87 = arith.mulf %86, %85 : vector<2x32xf32>
    %88 = arith.mulf %77, %45 : vector<2x32xf32>
    %89 = arith.mulf %69, %79 : vector<2x32xf32>
    %90 = arith.addf %88, %89 : vector<2x32xf32>
    %91 = math.tanh %90 : vector<2x32xf32>
    %92 = arith.mulf %87, %91 : vector<2x32xf32>
    %c0_38 = arith.constant 0 : index
    %93 = arith.index_cast %55 : i32 to index
    %c0_39 = arith.constant 0 : index
    %c0_40 = arith.constant 0 : index
    %94 = vector.load %arg4[%c0_38, %93, %c0_39, %c0_40] : memref<1x8x2x32xf32, #tpu.memory_space<vmem>>, vector<1x1x2x32xf32>
    %95 = vector.shape_cast %94 : vector<1x1x2x32xf32> to vector<2x32xf32>
    %96 = vector.shape_cast %92 : vector<2x32xf32> to vector<1x1x2x32xf32>
    tpu.vector_store %arg4[%c0_38, %93, %c0_39, %c0_40], %96 {strides = array<i32>} : memref<1x8x2x32xf32, #tpu.memory_space<vmem>>, vector<1x1x2x32xf32>,
    %c2_i32_41 = arith.constant 2 : i32
    %c2_i32_42 = arith.constant 2 : i32
    %97 = arith.muli %c2_i32_42, %c2_i32_41 : i32
    %c7_i32_43 = arith.constant 7 : i32
    %98 = arith.subi %c7_i32_43, %97 : i32
    %99 = arith.muli %arg0, %98 : i32
    %100 = arith.addi %c2_i32_41, %99 : i32
    %c0_44 = arith.constant 0 : index
    %101 = arith.index_cast %100 : i32 to index
    %c0_45 = arith.constant 0 : index
    %c0_46 = arith.constant 0 : index
    %102 = vector.load %arg2[%c0_44, %101, %c0_45, %c0_46] : memref<1x8x2x128xf32, #tpu.memory_space<vmem>>, vector<1x1x2x128xf32>
    %103 = vector.shape_cast %102 : vector<1x1x2x128xf32> to vector<2x128xf32>
    %104 = arith.truncf %92 : vector<2x32xf32> to vector<2x32xbf16>
    %cst_47 = arith.constant dense<0.000000e+00> : vector<2x128xf32>
    %105 = tpu.matmul %104, %4, %cst_47 {dimension_numbers = #tpu.dot_dimension_numbers<[1], [0], [0], [1], [0, 0, 1, 1], [], []>} : vector<2x32xbf16>, vector<32x128xbf16>, vector<2x128xf32> -> vector<2x128xf32>
    %106 = arith.addf %103, %105 : vector<2x128xf32>
    %107 = vector.extract_strided_slice %106 {offsets = [0, 0], sizes = [2, 32], strides = [1, 1]} : vector<2x128xf32> to vector<2x32xf32>
    %cst_48 = arith.constant 5.000000e-01 : f32
    %108 = vector.broadcast %cst_48 : f32 to vector<2x32xf32>
    %109 = arith.mulf %108, %107 : vector<2x32xf32>
    %110 = math.tanh %109 : vector<2x32xf32>
    %cst_49 = arith.constant 1.000000e+00 : f32
    %111 = vector.broadcast %cst_49 : f32 to vector<2x32xf32>
    %112 = arith.addf %110, %111 : vector<2x32xf32>
    %cst_50 = arith.constant 5.000000e-01 : f32
    %113 = vector.broadcast %cst_50 : f32 to vector<2x32xf32>
    %114 = arith.mulf %113, %112 : vector<2x32xf32>
    %115 = vector.extract_strided_slice %106 {offsets = [0, 32], sizes = [2, 32], strides = [1, 1]} : vector<2x128xf32> to vector<2x32xf32>
    %cst_51 = arith.constant 5.000000e-01 : f32
    %116 = vector.broadcast %cst_51 : f32 to vector<2x32xf32>
    %117 = arith.mulf %116, %115 : vector<2x32xf32>
    %118 = math.tanh %117 : vector<2x32xf32>
    %cst_52 = arith.constant 1.000000e+00 : f32
    %119 = vector.broadcast %cst_52 : f32 to vector<2x32xf32>
    %120 = arith.addf %118, %119 : vector<2x32xf32>
    %cst_53 = arith.constant 5.000000e-01 : f32
    %121 = vector.broadcast %cst_53 : f32 to vector<2x32xf32>
    %122 = arith.mulf %121, %120 : vector<2x32xf32>
    %123 = vector.extract_strided_slice %106 {offsets = [0, 64], sizes = [2, 32], strides = [1, 1]} : vector<2x128xf32> to vector<2x32xf32>
    %124 = math.tanh %123 : vector<2x32xf32>
    %125 = vector.extract_strided_slice %106 {offsets = [0, 96], sizes = [2, 32], strides = [1, 1]} : vector<2x128xf32> to vector<2x32xf32>
    %cst_54 = arith.constant 5.000000e-01 : f32
    %126 = vector.broadcast %cst_54 : f32 to vector<2x32xf32>
    %127 = arith.mulf %126, %125 : vector<2x32xf32>
    %128 = math.tanh %127 : vector<2x32xf32>
    %cst_55 = arith.constant 1.000000e+00 : f32
    %129 = vector.broadcast %cst_55 : f32 to vector<2x32xf32>
    %130 = arith.addf %128, %129 : vector<2x32xf32>
    %cst_56 = arith.constant 5.000000e-01 : f32
    %131 = vector.broadcast %cst_56 : f32 to vector<2x32xf32>
    %132 = arith.mulf %131, %130 : vector<2x32xf32>
    %133 = arith.mulf %122, %90 : vector<2x32xf32>
    %134 = arith.mulf %114, %124 : vector<2x32xf32>
    %135 = arith.addf %133, %134 : vector<2x32xf32>
    %136 = math.tanh %135 : vector<2x32xf32>
    %137 = arith.mulf %132, %136 : vector<2x32xf32>
    %c0_57 = arith.constant 0 : index
    %138 = arith.index_cast %100 : i32 to index
    %c0_58 = arith.constant 0 : index
    %c0_59 = arith.constant 0 : index
    %139 = vector.load %arg4[%c0_57, %138, %c0_58, %c0_59] : memref<1x8x2x32xf32, #tpu.memory_space<vmem>>, vector<1x1x2x32xf32>
    %140 = vector.shape_cast %139 : vector<1x1x2x32xf32> to vector<2x32xf32>
    %141 = vector.shape_cast %137 : vector<2x32xf32> to vector<1x1x2x32xf32>
    tpu.vector_store %arg4[%c0_57, %138, %c0_58, %c0_59], %141 {strides = array<i32>} : memref<1x8x2x32xf32, #tpu.memory_space<vmem>>, vector<1x1x2x32xf32>,
    %c3_i32 = arith.constant 3 : i32
    %c2_i32_60 = arith.constant 2 : i32
    %142 = arith.muli %c2_i32_60, %c3_i32 : i32
    %c7_i32_61 = arith.constant 7 : i32
    %143 = arith.subi %c7_i32_61, %142 : i32
    %144 = arith.muli %arg0, %143 : i32
    %145 = arith.addi %c3_i32, %144 : i32
    %c0_62 = arith.constant 0 : index
    %146 = arith.index_cast %145 : i32 to index
    %c0_63 = arith.constant 0 : index
    %c0_64 = arith.constant 0 : index
    %147 = vector.load %arg2[%c0_62, %146, %c0_63, %c0_64] : memref<1x8x2x128xf32, #tpu.memory_space<vmem>>, vector<1x1x2x128xf32>
    %148 = vector.shape_cast %147 : vector<1x1x2x128xf32> to vector<2x128xf32>
    %149 = arith.truncf %137 : vector<2x32xf32> to vector<2x32xbf16>
    %cst_65 = arith.constant dense<0.000000e+00> : vector<2x128xf32>
    %150 = tpu.matmul %149, %4, %cst_65 {dimension_numbers = #tpu.dot_dimension_numbers<[1], [0], [0], [1], [0, 0, 1, 1], [], []>} : vector<2x32xbf16>, vector<32x128xbf16>, vector<2x128xf32> -> vector<2x128xf32>
    %151 = arith.addf %148, %150 : vector<2x128xf32>
    %152 = vector.extract_strided_slice %151 {offsets = [0, 0], sizes = [2, 32], strides = [1, 1]} : vector<2x128xf32> to vector<2x32xf32>
    %cst_66 = arith.constant 5.000000e-01 : f32
    %153 = vector.broadcast %cst_66 : f32 to vector<2x32xf32>
    %154 = arith.mulf %153, %152 : vector<2x32xf32>
    %155 = math.tanh %154 : vector<2x32xf32>
    %cst_67 = arith.constant 1.000000e+00 : f32
    %156 = vector.broadcast %cst_67 : f32 to vector<2x32xf32>
    %157 = arith.addf %155, %156 : vector<2x32xf32>
    %cst_68 = arith.constant 5.000000e-01 : f32
    %158 = vector.broadcast %cst_68 : f32 to vector<2x32xf32>
    %159 = arith.mulf %158, %157 : vector<2x32xf32>
    %160 = vector.extract_strided_slice %151 {offsets = [0, 32], sizes = [2, 32], strides = [1, 1]} : vector<2x128xf32> to vector<2x32xf32>
    %cst_69 = arith.constant 5.000000e-01 : f32
    %161 = vector.broadcast %cst_69 : f32 to vector<2x32xf32>
    %162 = arith.mulf %161, %160 : vector<2x32xf32>
    %163 = math.tanh %162 : vector<2x32xf32>
    %cst_70 = arith.constant 1.000000e+00 : f32
    %164 = vector.broadcast %cst_70 : f32 to vector<2x32xf32>
    %165 = arith.addf %163, %164 : vector<2x32xf32>
    %cst_71 = arith.constant 5.000000e-01 : f32
    %166 = vector.broadcast %cst_71 : f32 to vector<2x32xf32>
    %167 = arith.mulf %166, %165 : vector<2x32xf32>
    %168 = vector.extract_strided_slice %151 {offsets = [0, 64], sizes = [2, 32], strides = [1, 1]} : vector<2x128xf32> to vector<2x32xf32>
    %169 = math.tanh %168 : vector<2x32xf32>
    %170 = vector.extract_strided_slice %151 {offsets = [0, 96], sizes = [2, 32], strides = [1, 1]} : vector<2x128xf32> to vector<2x32xf32>
    %cst_72 = arith.constant 5.000000e-01 : f32
    %171 = vector.broadcast %cst_72 : f32 to vector<2x32xf32>
    %172 = arith.mulf %171, %170 : vector<2x32xf32>
    %173 = math.tanh %172 : vector<2x32xf32>
    %cst_73 = arith.constant 1.000000e+00 : f32
    %174 = vector.broadcast %cst_73 : f32 to vector<2x32xf32>
    %175 = arith.addf %173, %174 : vector<2x32xf32>
    %cst_74 = arith.constant 5.000000e-01 : f32
    %176 = vector.broadcast %cst_74 : f32 to vector<2x32xf32>
    %177 = arith.mulf %176, %175 : vector<2x32xf32>
    %178 = arith.mulf %167, %135 : vector<2x32xf32>
    %179 = arith.mulf %159, %169 : vector<2x32xf32>
    %180 = arith.addf %178, %179 : vector<2x32xf32>
    %181 = math.tanh %180 : vector<2x32xf32>
    %182 = arith.mulf %177, %181 : vector<2x32xf32>
    %c0_75 = arith.constant 0 : index
    %183 = arith.index_cast %145 : i32 to index
    %c0_76 = arith.constant 0 : index
    %c0_77 = arith.constant 0 : index
    %184 = vector.load %arg4[%c0_75, %183, %c0_76, %c0_77] : memref<1x8x2x32xf32, #tpu.memory_space<vmem>>, vector<1x1x2x32xf32>
    %185 = vector.shape_cast %184 : vector<1x1x2x32xf32> to vector<2x32xf32>
    %186 = vector.shape_cast %182 : vector<2x32xf32> to vector<1x1x2x32xf32>
    tpu.vector_store %arg4[%c0_75, %183, %c0_76, %c0_77], %186 {strides = array<i32>} : memref<1x8x2x32xf32, #tpu.memory_space<vmem>>, vector<1x1x2x32xf32>,
    %c4_i32 = arith.constant 4 : i32
    %c2_i32_78 = arith.constant 2 : i32
    %187 = arith.muli %c2_i32_78, %c4_i32 : i32
    %c7_i32_79 = arith.constant 7 : i32
    %188 = arith.subi %c7_i32_79, %187 : i32
    %189 = arith.muli %arg0, %188 : i32
    %190 = arith.addi %c4_i32, %189 : i32
    %c0_80 = arith.constant 0 : index
    %191 = arith.index_cast %190 : i32 to index
    %c0_81 = arith.constant 0 : index
    %c0_82 = arith.constant 0 : index
    %192 = vector.load %arg2[%c0_80, %191, %c0_81, %c0_82] : memref<1x8x2x128xf32, #tpu.memory_space<vmem>>, vector<1x1x2x128xf32>
    %193 = vector.shape_cast %192 : vector<1x1x2x128xf32> to vector<2x128xf32>
    %194 = arith.truncf %182 : vector<2x32xf32> to vector<2x32xbf16>
    %cst_83 = arith.constant dense<0.000000e+00> : vector<2x128xf32>
    %195 = tpu.matmul %194, %4, %cst_83 {dimension_numbers = #tpu.dot_dimension_numbers<[1], [0], [0], [1], [0, 0, 1, 1], [], []>} : vector<2x32xbf16>, vector<32x128xbf16>, vector<2x128xf32> -> vector<2x128xf32>
    %196 = arith.addf %193, %195 : vector<2x128xf32>
    %197 = vector.extract_strided_slice %196 {offsets = [0, 0], sizes = [2, 32], strides = [1, 1]} : vector<2x128xf32> to vector<2x32xf32>
    %cst_84 = arith.constant 5.000000e-01 : f32
    %198 = vector.broadcast %cst_84 : f32 to vector<2x32xf32>
    %199 = arith.mulf %198, %197 : vector<2x32xf32>
    %200 = math.tanh %199 : vector<2x32xf32>
    %cst_85 = arith.constant 1.000000e+00 : f32
    %201 = vector.broadcast %cst_85 : f32 to vector<2x32xf32>
    %202 = arith.addf %200, %201 : vector<2x32xf32>
    %cst_86 = arith.constant 5.000000e-01 : f32
    %203 = vector.broadcast %cst_86 : f32 to vector<2x32xf32>
    %204 = arith.mulf %203, %202 : vector<2x32xf32>
    %205 = vector.extract_strided_slice %196 {offsets = [0, 32], sizes = [2, 32], strides = [1, 1]} : vector<2x128xf32> to vector<2x32xf32>
    %cst_87 = arith.constant 5.000000e-01 : f32
    %206 = vector.broadcast %cst_87 : f32 to vector<2x32xf32>
    %207 = arith.mulf %206, %205 : vector<2x32xf32>
    %208 = math.tanh %207 : vector<2x32xf32>
    %cst_88 = arith.constant 1.000000e+00 : f32
    %209 = vector.broadcast %cst_88 : f32 to vector<2x32xf32>
    %210 = arith.addf %208, %209 : vector<2x32xf32>
    %cst_89 = arith.constant 5.000000e-01 : f32
    %211 = vector.broadcast %cst_89 : f32 to vector<2x32xf32>
    %212 = arith.mulf %211, %210 : vector<2x32xf32>
    %213 = vector.extract_strided_slice %196 {offsets = [0, 64], sizes = [2, 32], strides = [1, 1]} : vector<2x128xf32> to vector<2x32xf32>
    %214 = math.tanh %213 : vector<2x32xf32>
    %215 = vector.extract_strided_slice %196 {offsets = [0, 96], sizes = [2, 32], strides = [1, 1]} : vector<2x128xf32> to vector<2x32xf32>
    %cst_90 = arith.constant 5.000000e-01 : f32
    %216 = vector.broadcast %cst_90 : f32 to vector<2x32xf32>
    %217 = arith.mulf %216, %215 : vector<2x32xf32>
    %218 = math.tanh %217 : vector<2x32xf32>
    %cst_91 = arith.constant 1.000000e+00 : f32
    %219 = vector.broadcast %cst_91 : f32 to vector<2x32xf32>
    %220 = arith.addf %218, %219 : vector<2x32xf32>
    %cst_92 = arith.constant 5.000000e-01 : f32
    %221 = vector.broadcast %cst_92 : f32 to vector<2x32xf32>
    %222 = arith.mulf %221, %220 : vector<2x32xf32>
    %223 = arith.mulf %212, %180 : vector<2x32xf32>
    %224 = arith.mulf %204, %214 : vector<2x32xf32>
    %225 = arith.addf %223, %224 : vector<2x32xf32>
    %226 = math.tanh %225 : vector<2x32xf32>
    %227 = arith.mulf %222, %226 : vector<2x32xf32>
    %c0_93 = arith.constant 0 : index
    %228 = arith.index_cast %190 : i32 to index
    %c0_94 = arith.constant 0 : index
    %c0_95 = arith.constant 0 : index
    %229 = vector.load %arg4[%c0_93, %228, %c0_94, %c0_95] : memref<1x8x2x32xf32, #tpu.memory_space<vmem>>, vector<1x1x2x32xf32>
    %230 = vector.shape_cast %229 : vector<1x1x2x32xf32> to vector<2x32xf32>
    %231 = vector.shape_cast %227 : vector<2x32xf32> to vector<1x1x2x32xf32>
    tpu.vector_store %arg4[%c0_93, %228, %c0_94, %c0_95], %231 {strides = array<i32>} : memref<1x8x2x32xf32, #tpu.memory_space<vmem>>, vector<1x1x2x32xf32>,
    %c5_i32 = arith.constant 5 : i32
    %c2_i32_96 = arith.constant 2 : i32
    %232 = arith.muli %c2_i32_96, %c5_i32 : i32
    %c7_i32_97 = arith.constant 7 : i32
    %233 = arith.subi %c7_i32_97, %232 : i32
    %234 = arith.muli %arg0, %233 : i32
    %235 = arith.addi %c5_i32, %234 : i32
    %c0_98 = arith.constant 0 : index
    %236 = arith.index_cast %235 : i32 to index
    %c0_99 = arith.constant 0 : index
    %c0_100 = arith.constant 0 : index
    %237 = vector.load %arg2[%c0_98, %236, %c0_99, %c0_100] : memref<1x8x2x128xf32, #tpu.memory_space<vmem>>, vector<1x1x2x128xf32>
    %238 = vector.shape_cast %237 : vector<1x1x2x128xf32> to vector<2x128xf32>
    %239 = arith.truncf %227 : vector<2x32xf32> to vector<2x32xbf16>
    %cst_101 = arith.constant dense<0.000000e+00> : vector<2x128xf32>
    %240 = tpu.matmul %239, %4, %cst_101 {dimension_numbers = #tpu.dot_dimension_numbers<[1], [0], [0], [1], [0, 0, 1, 1], [], []>} : vector<2x32xbf16>, vector<32x128xbf16>, vector<2x128xf32> -> vector<2x128xf32>
    %241 = arith.addf %238, %240 : vector<2x128xf32>
    %242 = vector.extract_strided_slice %241 {offsets = [0, 0], sizes = [2, 32], strides = [1, 1]} : vector<2x128xf32> to vector<2x32xf32>
    %cst_102 = arith.constant 5.000000e-01 : f32
    %243 = vector.broadcast %cst_102 : f32 to vector<2x32xf32>
    %244 = arith.mulf %243, %242 : vector<2x32xf32>
    %245 = math.tanh %244 : vector<2x32xf32>
    %cst_103 = arith.constant 1.000000e+00 : f32
    %246 = vector.broadcast %cst_103 : f32 to vector<2x32xf32>
    %247 = arith.addf %245, %246 : vector<2x32xf32>
    %cst_104 = arith.constant 5.000000e-01 : f32
    %248 = vector.broadcast %cst_104 : f32 to vector<2x32xf32>
    %249 = arith.mulf %248, %247 : vector<2x32xf32>
    %250 = vector.extract_strided_slice %241 {offsets = [0, 32], sizes = [2, 32], strides = [1, 1]} : vector<2x128xf32> to vector<2x32xf32>
    %cst_105 = arith.constant 5.000000e-01 : f32
    %251 = vector.broadcast %cst_105 : f32 to vector<2x32xf32>
    %252 = arith.mulf %251, %250 : vector<2x32xf32>
    %253 = math.tanh %252 : vector<2x32xf32>
    %cst_106 = arith.constant 1.000000e+00 : f32
    %254 = vector.broadcast %cst_106 : f32 to vector<2x32xf32>
    %255 = arith.addf %253, %254 : vector<2x32xf32>
    %cst_107 = arith.constant 5.000000e-01 : f32
    %256 = vector.broadcast %cst_107 : f32 to vector<2x32xf32>
    %257 = arith.mulf %256, %255 : vector<2x32xf32>
    %258 = vector.extract_strided_slice %241 {offsets = [0, 64], sizes = [2, 32], strides = [1, 1]} : vector<2x128xf32> to vector<2x32xf32>
    %259 = math.tanh %258 : vector<2x32xf32>
    %260 = vector.extract_strided_slice %241 {offsets = [0, 96], sizes = [2, 32], strides = [1, 1]} : vector<2x128xf32> to vector<2x32xf32>
    %cst_108 = arith.constant 5.000000e-01 : f32
    %261 = vector.broadcast %cst_108 : f32 to vector<2x32xf32>
    %262 = arith.mulf %261, %260 : vector<2x32xf32>
    %263 = math.tanh %262 : vector<2x32xf32>
    %cst_109 = arith.constant 1.000000e+00 : f32
    %264 = vector.broadcast %cst_109 : f32 to vector<2x32xf32>
    %265 = arith.addf %263, %264 : vector<2x32xf32>
    %cst_110 = arith.constant 5.000000e-01 : f32
    %266 = vector.broadcast %cst_110 : f32 to vector<2x32xf32>
    %267 = arith.mulf %266, %265 : vector<2x32xf32>
    %268 = arith.mulf %257, %225 : vector<2x32xf32>
    %269 = arith.mulf %249, %259 : vector<2x32xf32>
    %270 = arith.addf %268, %269 : vector<2x32xf32>
    %271 = math.tanh %270 : vector<2x32xf32>
    %272 = arith.mulf %267, %271 : vector<2x32xf32>
    %c0_111 = arith.constant 0 : index
    %273 = arith.index_cast %235 : i32 to index
    %c0_112 = arith.constant 0 : index
    %c0_113 = arith.constant 0 : index
    %274 = vector.load %arg4[%c0_111, %273, %c0_112, %c0_113] : memref<1x8x2x32xf32, #tpu.memory_space<vmem>>, vector<1x1x2x32xf32>
    %275 = vector.shape_cast %274 : vector<1x1x2x32xf32> to vector<2x32xf32>
    %276 = vector.shape_cast %272 : vector<2x32xf32> to vector<1x1x2x32xf32>
    tpu.vector_store %arg4[%c0_111, %273, %c0_112, %c0_113], %276 {strides = array<i32>} : memref<1x8x2x32xf32, #tpu.memory_space<vmem>>, vector<1x1x2x32xf32>,
    %c6_i32 = arith.constant 6 : i32
    %c2_i32_114 = arith.constant 2 : i32
    %277 = arith.muli %c2_i32_114, %c6_i32 : i32
    %c7_i32_115 = arith.constant 7 : i32
    %278 = arith.subi %c7_i32_115, %277 : i32
    %279 = arith.muli %arg0, %278 : i32
    %280 = arith.addi %c6_i32, %279 : i32
    %c0_116 = arith.constant 0 : index
    %281 = arith.index_cast %280 : i32 to index
    %c0_117 = arith.constant 0 : index
    %c0_118 = arith.constant 0 : index
    %282 = vector.load %arg2[%c0_116, %281, %c0_117, %c0_118] : memref<1x8x2x128xf32, #tpu.memory_space<vmem>>, vector<1x1x2x128xf32>
    %283 = vector.shape_cast %282 : vector<1x1x2x128xf32> to vector<2x128xf32>
    %284 = arith.truncf %272 : vector<2x32xf32> to vector<2x32xbf16>
    %cst_119 = arith.constant dense<0.000000e+00> : vector<2x128xf32>
    %285 = tpu.matmul %284, %4, %cst_119 {dimension_numbers = #tpu.dot_dimension_numbers<[1], [0], [0], [1], [0, 0, 1, 1], [], []>} : vector<2x32xbf16>, vector<32x128xbf16>, vector<2x128xf32> -> vector<2x128xf32>
    %286 = arith.addf %283, %285 : vector<2x128xf32>
    %287 = vector.extract_strided_slice %286 {offsets = [0, 0], sizes = [2, 32], strides = [1, 1]} : vector<2x128xf32> to vector<2x32xf32>
    %cst_120 = arith.constant 5.000000e-01 : f32
    %288 = vector.broadcast %cst_120 : f32 to vector<2x32xf32>
    %289 = arith.mulf %288, %287 : vector<2x32xf32>
    %290 = math.tanh %289 : vector<2x32xf32>
    %cst_121 = arith.constant 1.000000e+00 : f32
    %291 = vector.broadcast %cst_121 : f32 to vector<2x32xf32>
    %292 = arith.addf %290, %291 : vector<2x32xf32>
    %cst_122 = arith.constant 5.000000e-01 : f32
    %293 = vector.broadcast %cst_122 : f32 to vector<2x32xf32>
    %294 = arith.mulf %293, %292 : vector<2x32xf32>
    %295 = vector.extract_strided_slice %286 {offsets = [0, 32], sizes = [2, 32], strides = [1, 1]} : vector<2x128xf32> to vector<2x32xf32>
    %cst_123 = arith.constant 5.000000e-01 : f32
    %296 = vector.broadcast %cst_123 : f32 to vector<2x32xf32>
    %297 = arith.mulf %296, %295 : vector<2x32xf32>
    %298 = math.tanh %297 : vector<2x32xf32>
    %cst_124 = arith.constant 1.000000e+00 : f32
    %299 = vector.broadcast %cst_124 : f32 to vector<2x32xf32>
    %300 = arith.addf %298, %299 : vector<2x32xf32>
    %cst_125 = arith.constant 5.000000e-01 : f32
    %301 = vector.broadcast %cst_125 : f32 to vector<2x32xf32>
    %302 = arith.mulf %301, %300 : vector<2x32xf32>
    %303 = vector.extract_strided_slice %286 {offsets = [0, 64], sizes = [2, 32], strides = [1, 1]} : vector<2x128xf32> to vector<2x32xf32>
    %304 = math.tanh %303 : vector<2x32xf32>
    %305 = vector.extract_strided_slice %286 {offsets = [0, 96], sizes = [2, 32], strides = [1, 1]} : vector<2x128xf32> to vector<2x32xf32>
    %cst_126 = arith.constant 5.000000e-01 : f32
    %306 = vector.broadcast %cst_126 : f32 to vector<2x32xf32>
    %307 = arith.mulf %306, %305 : vector<2x32xf32>
    %308 = math.tanh %307 : vector<2x32xf32>
    %cst_127 = arith.constant 1.000000e+00 : f32
    %309 = vector.broadcast %cst_127 : f32 to vector<2x32xf32>
    %310 = arith.addf %308, %309 : vector<2x32xf32>
    %cst_128 = arith.constant 5.000000e-01 : f32
    %311 = vector.broadcast %cst_128 : f32 to vector<2x32xf32>
    %312 = arith.mulf %311, %310 : vector<2x32xf32>
    %313 = arith.mulf %302, %270 : vector<2x32xf32>
    %314 = arith.mulf %294, %304 : vector<2x32xf32>
    %315 = arith.addf %313, %314 : vector<2x32xf32>
    %316 = math.tanh %315 : vector<2x32xf32>
    %317 = arith.mulf %312, %316 : vector<2x32xf32>
    %c0_129 = arith.constant 0 : index
    %318 = arith.index_cast %280 : i32 to index
    %c0_130 = arith.constant 0 : index
    %c0_131 = arith.constant 0 : index
    %319 = vector.load %arg4[%c0_129, %318, %c0_130, %c0_131] : memref<1x8x2x32xf32, #tpu.memory_space<vmem>>, vector<1x1x2x32xf32>
    %320 = vector.shape_cast %319 : vector<1x1x2x32xf32> to vector<2x32xf32>
    %321 = vector.shape_cast %317 : vector<2x32xf32> to vector<1x1x2x32xf32>
    tpu.vector_store %arg4[%c0_129, %318, %c0_130, %c0_131], %321 {strides = array<i32>} : memref<1x8x2x32xf32, #tpu.memory_space<vmem>>, vector<1x1x2x32xf32>,
    %c7_i32_132 = arith.constant 7 : i32
    %c2_i32_133 = arith.constant 2 : i32
    %322 = arith.muli %c2_i32_133, %c7_i32_132 : i32
    %c7_i32_134 = arith.constant 7 : i32
    %323 = arith.subi %c7_i32_134, %322 : i32
    %324 = arith.muli %arg0, %323 : i32
    %325 = arith.addi %c7_i32_132, %324 : i32
    %c0_135 = arith.constant 0 : index
    %326 = arith.index_cast %325 : i32 to index
    %c0_136 = arith.constant 0 : index
    %c0_137 = arith.constant 0 : index
    %327 = vector.load %arg2[%c0_135, %326, %c0_136, %c0_137] : memref<1x8x2x128xf32, #tpu.memory_space<vmem>>, vector<1x1x2x128xf32>
    %328 = vector.shape_cast %327 : vector<1x1x2x128xf32> to vector<2x128xf32>
    %329 = arith.truncf %317 : vector<2x32xf32> to vector<2x32xbf16>
    %cst_138 = arith.constant dense<0.000000e+00> : vector<2x128xf32>
    %330 = tpu.matmul %329, %4, %cst_138 {dimension_numbers = #tpu.dot_dimension_numbers<[1], [0], [0], [1], [0, 0, 1, 1], [], []>} : vector<2x32xbf16>, vector<32x128xbf16>, vector<2x128xf32> -> vector<2x128xf32>
    %331 = arith.addf %328, %330 : vector<2x128xf32>
    %332 = vector.extract_strided_slice %331 {offsets = [0, 0], sizes = [2, 32], strides = [1, 1]} : vector<2x128xf32> to vector<2x32xf32>
    %cst_139 = arith.constant 5.000000e-01 : f32
    %333 = vector.broadcast %cst_139 : f32 to vector<2x32xf32>
    %334 = arith.mulf %333, %332 : vector<2x32xf32>
    %335 = math.tanh %334 : vector<2x32xf32>
    %cst_140 = arith.constant 1.000000e+00 : f32
    %336 = vector.broadcast %cst_140 : f32 to vector<2x32xf32>
    %337 = arith.addf %335, %336 : vector<2x32xf32>
    %cst_141 = arith.constant 5.000000e-01 : f32
    %338 = vector.broadcast %cst_141 : f32 to vector<2x32xf32>
    %339 = arith.mulf %338, %337 : vector<2x32xf32>
    %340 = vector.extract_strided_slice %331 {offsets = [0, 32], sizes = [2, 32], strides = [1, 1]} : vector<2x128xf32> to vector<2x32xf32>
    %cst_142 = arith.constant 5.000000e-01 : f32
    %341 = vector.broadcast %cst_142 : f32 to vector<2x32xf32>
    %342 = arith.mulf %341, %340 : vector<2x32xf32>
    %343 = math.tanh %342 : vector<2x32xf32>
    %cst_143 = arith.constant 1.000000e+00 : f32
    %344 = vector.broadcast %cst_143 : f32 to vector<2x32xf32>
    %345 = arith.addf %343, %344 : vector<2x32xf32>
    %cst_144 = arith.constant 5.000000e-01 : f32
    %346 = vector.broadcast %cst_144 : f32 to vector<2x32xf32>
    %347 = arith.mulf %346, %345 : vector<2x32xf32>
    %348 = vector.extract_strided_slice %331 {offsets = [0, 64], sizes = [2, 32], strides = [1, 1]} : vector<2x128xf32> to vector<2x32xf32>
    %349 = math.tanh %348 : vector<2x32xf32>
    %350 = vector.extract_strided_slice %331 {offsets = [0, 96], sizes = [2, 32], strides = [1, 1]} : vector<2x128xf32> to vector<2x32xf32>
    %cst_145 = arith.constant 5.000000e-01 : f32
    %351 = vector.broadcast %cst_145 : f32 to vector<2x32xf32>
    %352 = arith.mulf %351, %350 : vector<2x32xf32>
    %353 = math.tanh %352 : vector<2x32xf32>
    %cst_146 = arith.constant 1.000000e+00 : f32
    %354 = vector.broadcast %cst_146 : f32 to vector<2x32xf32>
    %355 = arith.addf %353, %354 : vector<2x32xf32>
    %cst_147 = arith.constant 5.000000e-01 : f32
    %356 = vector.broadcast %cst_147 : f32 to vector<2x32xf32>
    %357 = arith.mulf %356, %355 : vector<2x32xf32>
    %358 = arith.mulf %347, %315 : vector<2x32xf32>
    %359 = arith.mulf %339, %349 : vector<2x32xf32>
    %360 = arith.addf %358, %359 : vector<2x32xf32>
    %361 = math.tanh %360 : vector<2x32xf32>
    %362 = arith.mulf %357, %361 : vector<2x32xf32>
    %c0_148 = arith.constant 0 : index
    %363 = arith.index_cast %325 : i32 to index
    %c0_149 = arith.constant 0 : index
    %c0_150 = arith.constant 0 : index
    %364 = vector.load %arg4[%c0_148, %363, %c0_149, %c0_150] : memref<1x8x2x32xf32, #tpu.memory_space<vmem>>, vector<1x1x2x32xf32>
    %365 = vector.shape_cast %364 : vector<1x1x2x32xf32> to vector<2x32xf32>
    %366 = vector.shape_cast %362 : vector<2x32xf32> to vector<1x1x2x32xf32>
    tpu.vector_store %arg4[%c0_148, %363, %c0_149, %c0_150], %366 {strides = array<i32>} : memref<1x8x2x32xf32, #tpu.memory_space<vmem>>, vector<1x1x2x32xf32>,
    %c8_i32 = arith.constant 8 : i32
    %c0_151 = arith.constant 0 : index
    %c0_152 = arith.constant 0 : index
    %367 = vector.load %arg5[%c0_151, %c0_152] : memref<2x32xf32, #tpu.memory_space<vmem>>, vector<2x32xf32>
    tpu.vector_store %arg5[%c0_151, %c0_152], %362 {strides = array<i32>} : memref<2x32xf32, #tpu.memory_space<vmem>>, vector<2x32xf32>,
    %c0_153 = arith.constant 0 : index
    %c0_154 = arith.constant 0 : index
    %368 = vector.load %arg6[%c0_153, %c0_154] : memref<2x32xf32, #tpu.memory_space<vmem>>, vector<2x32xf32>
    tpu.vector_store %arg6[%c0_153, %c0_154], %360 {strides = array<i32>} : memref<2x32xf32, #tpu.memory_space<vmem>>, vector<2x32xf32>,
    return
  }
  func.func @transform_0(%arg0: i32, %arg1: i32) -> (i32, i32, i32, i32) {
    %c2_i32 = arith.constant 2 : i32
    %0 = arith.muli %c2_i32, %arg1 : i32
    %c0_i32 = arith.constant 0 : i32
    %1 = arith.subi %c0_i32, %0 : i32
    %2 = arith.muli %arg0, %1 : i32
    %3 = arith.addi %arg1, %2 : i32
    %c0_i32_0 = arith.constant 0 : i32
    %c0_i32_1 = arith.constant 0 : i32
    %c0_i32_2 = arith.constant 0 : i32
    return %arg0, %3, %c0_i32_0, %c0_i32_1 : i32, i32, i32, i32
  }
  func.func @transform_1(%arg0: i32, %arg1: i32) -> (i32, i32, i32) {
    %c0_i32 = arith.constant 0 : i32
    %c0_i32_0 = arith.constant 0 : i32
    %c0_i32_1 = arith.constant 0 : i32
    return %arg0, %c0_i32, %c0_i32_0 : i32, i32, i32
  }
  func.func @transform_2(%arg0: i32, %arg1: i32) -> (i32, i32, i32, i32) {
    %c2_i32 = arith.constant 2 : i32
    %0 = arith.muli %c2_i32, %arg1 : i32
    %c0_i32 = arith.constant 0 : i32
    %1 = arith.subi %c0_i32, %0 : i32
    %2 = arith.muli %arg0, %1 : i32
    %3 = arith.addi %arg1, %2 : i32
    %c0_i32_0 = arith.constant 0 : i32
    %c0_i32_1 = arith.constant 0 : i32
    %c0_i32_2 = arith.constant 0 : i32
    return %arg0, %3, %c0_i32_0, %c0_i32_1 : i32, i32, i32, i32
  }
}

module attributes {stable_mosaic.version = 11 : i64} {
  func.func @kernel(%arg0: i32, %arg1: memref<2x8x64xf32, #tpu.memory_space<vmem>>, %arg2: memref<64x6xbf16, #tpu.memory_space<vmem>>, %arg3: memref<1x6xf32, #tpu.memory_space<vmem>>, %arg4: memref<1x6xf32, #tpu.memory_space<vmem>>, %arg5: memref<64x16xf32, #tpu.memory_space<vmem>>, %arg6: memref<1x16xf32, #tpu.memory_space<vmem>>, %arg7: memref<16x16xf32, #tpu.memory_space<vmem>>, %arg8: memref<1x16xf32, #tpu.memory_space<vmem>>, %arg9: memref<16x3xf32, #tpu.memory_space<vmem>>, %arg10: memref<1x3xf32, #tpu.memory_space<vmem>>, %arg11: memref<2x3xf32, #tpu.memory_space<vmem>>) attributes {dimension_semantics = [#tpu.dimension_semantics<parallel>], iteration_bounds = array<i64: 1>, scalar_prefetch = 0 : i64, scratch_operands = 0 : i64, tpu.core_type = #tpu.core_type<tc>, window_params = [{transform_indices = @transform_0, window_bounds = array<i64: 2, 8, 64>}, {pipeline_mode = #tpu.pipeline_mode<synchronous>, transform_indices = @transform_1, window_bounds = array<i64: 64, 6>}, {pipeline_mode = #tpu.pipeline_mode<synchronous>, transform_indices = @transform_2, window_bounds = array<i64: 1, 6>}, {pipeline_mode = #tpu.pipeline_mode<synchronous>, transform_indices = @transform_3, window_bounds = array<i64: 1, 6>}, {pipeline_mode = #tpu.pipeline_mode<synchronous>, transform_indices = @transform_4, window_bounds = array<i64: 64, 16>}, {pipeline_mode = #tpu.pipeline_mode<synchronous>, transform_indices = @transform_5, window_bounds = array<i64: 1, 16>}, {pipeline_mode = #tpu.pipeline_mode<synchronous>, transform_indices = @transform_6, window_bounds = array<i64: 16, 16>}, {pipeline_mode = #tpu.pipeline_mode<synchronous>, transform_indices = @transform_7, window_bounds = array<i64: 1, 16>}, {pipeline_mode = #tpu.pipeline_mode<synchronous>, transform_indices = @transform_8, window_bounds = array<i64: 16, 3>}, {pipeline_mode = #tpu.pipeline_mode<synchronous>, transform_indices = @transform_9, window_bounds = array<i64: 1, 3>}, {transform_indices = @transform_10, window_bounds = array<i64: 2, 3>}]} {
    %c0 = arith.constant 0 : index
    %c0_0 = arith.constant 0 : index
    %c0_1 = arith.constant 0 : index
    %0 = vector.load %arg1[%c0, %c0_0, %c0_1] : memref<2x8x64xf32, #tpu.memory_space<vmem>>, vector<2x8x64xf32>
    %1 = vector.shape_cast %0 : vector<2x8x64xf32> to vector<16x64xf32>
    %2 = arith.truncf %1 : vector<16x64xf32> to vector<16x64xbf16>
    %c0_2 = arith.constant 0 : index
    %c0_3 = arith.constant 0 : index
    %3 = vector.load %arg2[%c0_2, %c0_3] : memref<64x6xbf16, #tpu.memory_space<vmem>>, vector<64x6xbf16>
    %cst = arith.constant dense<0.000000e+00> : vector<16x6xf32>
    %4 = tpu.matmul %2, %3, %cst {dimension_numbers = #tpu.dot_dimension_numbers<[1], [0], [0], [1], [0, 0, 1, 1], [], []>} : vector<16x64xbf16>, vector<64x6xbf16>, vector<16x6xf32> -> vector<16x6xf32>
    %c0_4 = arith.constant 0 : index
    %c0_5 = arith.constant 0 : index
    %5 = vector.load %arg3[%c0_4, %c0_5] : memref<1x6xf32, #tpu.memory_space<vmem>>, vector<1x6xf32>
    %6 = vector.broadcast %5 : vector<1x6xf32> to vector<16x6xf32>
    %7 = arith.addf %4, %6 : vector<16x6xf32>
    %8 = math.tanh %7 : vector<16x6xf32>
    %9 = vector.shape_cast %8 : vector<16x6xf32> to vector<2x8x6xf32>
    %c0_6 = arith.constant 0 : index
    %c0_7 = arith.constant 0 : index
    %10 = vector.load %arg4[%c0_6, %c0_7] : memref<1x6xf32, #tpu.memory_space<vmem>>, vector<1x6xf32>
    %11 = vector.shape_cast %10 : vector<1x6xf32> to vector<1x1x6xf32>
    %12 = vector.broadcast %11 : vector<1x1x6xf32> to vector<2x8x6xf32>
    %13 = arith.mulf %9, %12 : vector<2x8x6xf32>
    %cst_8 = arith.constant dense<0.000000e+00> : vector<2x8xf32>
    %14 = vector.multi_reduction <add>, %13, %cst_8 [2] : vector<2x8x6xf32> to vector<2x8xf32>
    %cst_9 = arith.constant dense<0xFF800000> : vector<2xf32>
    %15 = vector.multi_reduction <maximumf>, %14, %cst_9 [1] : vector<2x8xf32> to vector<2xf32>
    %16 = vector.shape_cast %15 : vector<2xf32> to vector<2x1xf32>
    %17 = vector.broadcast %16 : vector<2x1xf32> to vector<2x8xf32>
    %18 = arith.subf %14, %17 : vector<2x8xf32>
    %19 = math.exp %18 : vector<2x8xf32>
    %cst_10 = arith.constant dense<0.000000e+00> : vector<2xf32>
    %20 = vector.multi_reduction <add>, %19, %cst_10 [1] : vector<2x8xf32> to vector<2xf32>
    %21 = vector.shape_cast %20 : vector<2xf32> to vector<2x1xf32>
    %22 = tpu.reciprocal %21 : vector<2x1xf32> -> vector<2x1xf32>
    %23 = vector.broadcast %22 : vector<2x1xf32> to vector<2x8xf32>
    %24 = arith.mulf %19, %23 : vector<2x8xf32>
    %25 = vector.shape_cast %24 : vector<2x8xf32> to vector<2x1x8xf32>
    "tpu.trace_start"() <{level = 10 : i32, message = "bqt,btd->bqd"}> : () -> ()
    %cst_11 = arith.constant dense<0.000000e+00> : vector<2x1x64xf32>
    %26 = tpu.matmul %25, %0, %cst_11 {dimension_numbers = #tpu.dot_dimension_numbers<[2], [1], [1], [2], [0, 0, 0, 1, 1, 2], [0], [0]>} : vector<2x1x8xf32>, vector<2x8x64xf32>, vector<2x1x64xf32> -> vector<2x1x64xf32>
    "tpu.trace_stop"() : () -> ()
    %27 = vector.shape_cast %26 : vector<2x1x64xf32> to vector<2x64xf32>
    %c0_12 = arith.constant 0 : index
    %c0_13 = arith.constant 0 : index
    %28 = vector.load %arg5[%c0_12, %c0_13] : memref<64x16xf32, #tpu.memory_space<vmem>>, vector<64x16xf32>
    %cst_14 = arith.constant dense<0.000000e+00> : vector<2x16xf32>
    %29 = tpu.matmul %27, %28, %cst_14 {dimension_numbers = #tpu.dot_dimension_numbers<[1], [0], [0], [1], [0, 0, 1, 1], [], []>} : vector<2x64xf32>, vector<64x16xf32>, vector<2x16xf32> -> vector<2x16xf32>
    %c0_15 = arith.constant 0 : index
    %c0_16 = arith.constant 0 : index
    %30 = vector.load %arg6[%c0_15, %c0_16] : memref<1x16xf32, #tpu.memory_space<vmem>>, vector<1x16xf32>
    %31 = vector.broadcast %30 : vector<1x16xf32> to vector<2x16xf32>
    %32 = arith.addf %29, %31 : vector<2x16xf32>
    %cst_17 = arith.constant 0.000000e+00 : f32
    %33 = vector.broadcast %cst_17 : f32 to vector<2x16xf32>
    %34 = arith.cmpf oge, %32, %33 : vector<2x16xf32>
    %cst_18 = arith.constant 0.00999999977 : f32
    %35 = vector.broadcast %cst_18 : f32 to vector<2x16xf32>
    %36 = arith.mulf %35, %32 : vector<2x16xf32>
    %37 = arith.select %34, %32, %36 : vector<2x16xi1>, vector<2x16xf32>
    %c0_19 = arith.constant 0 : index
    %c0_20 = arith.constant 0 : index
    %38 = vector.load %arg7[%c0_19, %c0_20] : memref<16x16xf32, #tpu.memory_space<vmem>>, vector<16x16xf32>
    %cst_21 = arith.constant dense<0.000000e+00> : vector<2x16xf32>
    %39 = tpu.matmul %37, %38, %cst_21 {dimension_numbers = #tpu.dot_dimension_numbers<[1], [0], [0], [1], [0, 0, 1, 1], [], []>} : vector<2x16xf32>, vector<16x16xf32>, vector<2x16xf32> -> vector<2x16xf32>
    %c0_22 = arith.constant 0 : index
    %c0_23 = arith.constant 0 : index
    %40 = vector.load %arg8[%c0_22, %c0_23] : memref<1x16xf32, #tpu.memory_space<vmem>>, vector<1x16xf32>
    %41 = vector.broadcast %40 : vector<1x16xf32> to vector<2x16xf32>
    %42 = arith.addf %39, %41 : vector<2x16xf32>
    %cst_24 = arith.constant 0.000000e+00 : f32
    %43 = vector.broadcast %cst_24 : f32 to vector<2x16xf32>
    %44 = arith.cmpf oge, %42, %43 : vector<2x16xf32>
    %cst_25 = arith.constant 0.00999999977 : f32
    %45 = vector.broadcast %cst_25 : f32 to vector<2x16xf32>
    %46 = arith.mulf %45, %42 : vector<2x16xf32>
    %47 = arith.select %44, %42, %46 : vector<2x16xi1>, vector<2x16xf32>
    %c0_26 = arith.constant 0 : index
    %c0_27 = arith.constant 0 : index
    %48 = vector.load %arg9[%c0_26, %c0_27] : memref<16x3xf32, #tpu.memory_space<vmem>>, vector<16x3xf32>
    %cst_28 = arith.constant dense<0.000000e+00> : vector<2x3xf32>
    %49 = tpu.matmul %47, %48, %cst_28 {dimension_numbers = #tpu.dot_dimension_numbers<[1], [0], [0], [1], [0, 0, 1, 1], [], []>} : vector<2x16xf32>, vector<16x3xf32>, vector<2x3xf32> -> vector<2x3xf32>
    %c0_29 = arith.constant 0 : index
    %c0_30 = arith.constant 0 : index
    %50 = vector.load %arg10[%c0_29, %c0_30] : memref<1x3xf32, #tpu.memory_space<vmem>>, vector<1x3xf32>
    %51 = vector.broadcast %50 : vector<1x3xf32> to vector<2x3xf32>
    %52 = arith.addf %49, %51 : vector<2x3xf32>
    %cst_31 = arith.constant 5.000000e-01 : f32
    %53 = vector.broadcast %cst_31 : f32 to vector<2x3xf32>
    %54 = arith.mulf %53, %52 : vector<2x3xf32>
    %55 = math.tanh %54 : vector<2x3xf32>
    %cst_32 = arith.constant 1.000000e+00 : f32
    %56 = vector.broadcast %cst_32 : f32 to vector<2x3xf32>
    %57 = arith.addf %55, %56 : vector<2x3xf32>
    %cst_33 = arith.constant 5.000000e-01 : f32
    %58 = vector.broadcast %cst_33 : f32 to vector<2x3xf32>
    %59 = arith.mulf %58, %57 : vector<2x3xf32>
    %c0_34 = arith.constant 0 : index
    %c0_35 = arith.constant 0 : index
    %60 = vector.load %arg11[%c0_34, %c0_35] : memref<2x3xf32, #tpu.memory_space<vmem>>, vector<2x3xf32>
    tpu.vector_store %arg11[%c0_34, %c0_35], %59 {strides = array<i32>} : memref<2x3xf32, #tpu.memory_space<vmem>>, vector<2x3xf32>,
    return
  }
  func.func @transform_0(%arg0: i32) -> (i32, i32, i32) {
    %c0_i32 = arith.constant 0 : i32
    %c0_i32_0 = arith.constant 0 : i32
    %c0_i32_1 = arith.constant 0 : i32
    return %arg0, %c0_i32, %c0_i32_0 : i32, i32, i32
  }
  func.func @transform_1(%arg0: i32) -> (i32, i32) {
    %c0_i32 = arith.constant 0 : i32
    %c0_i32_0 = arith.constant 0 : i32
    %c0_i32_1 = arith.constant 0 : i32
    return %c0_i32, %c0_i32_0 : i32, i32
  }
  func.func @transform_2(%arg0: i32) -> (i32, i32) {
    %c0_i32 = arith.constant 0 : i32
    %c0_i32_0 = arith.constant 0 : i32
    %c0_i32_1 = arith.constant 0 : i32
    return %c0_i32, %c0_i32_0 : i32, i32
  }
  func.func @transform_3(%arg0: i32) -> (i32, i32) {
    %c0_i32 = arith.constant 0 : i32
    %c0_i32_0 = arith.constant 0 : i32
    %c0_i32_1 = arith.constant 0 : i32
    return %c0_i32, %c0_i32_0 : i32, i32
  }
  func.func @transform_4(%arg0: i32) -> (i32, i32) {
    %c0_i32 = arith.constant 0 : i32
    %c0_i32_0 = arith.constant 0 : i32
    %c0_i32_1 = arith.constant 0 : i32
    return %c0_i32, %c0_i32_0 : i32, i32
  }
  func.func @transform_5(%arg0: i32) -> (i32, i32) {
    %c0_i32 = arith.constant 0 : i32
    %c0_i32_0 = arith.constant 0 : i32
    %c0_i32_1 = arith.constant 0 : i32
    return %c0_i32, %c0_i32_0 : i32, i32
  }
  func.func @transform_6(%arg0: i32) -> (i32, i32) {
    %c0_i32 = arith.constant 0 : i32
    %c0_i32_0 = arith.constant 0 : i32
    %c0_i32_1 = arith.constant 0 : i32
    return %c0_i32, %c0_i32_0 : i32, i32
  }
  func.func @transform_7(%arg0: i32) -> (i32, i32) {
    %c0_i32 = arith.constant 0 : i32
    %c0_i32_0 = arith.constant 0 : i32
    %c0_i32_1 = arith.constant 0 : i32
    return %c0_i32, %c0_i32_0 : i32, i32
  }
  func.func @transform_8(%arg0: i32) -> (i32, i32) {
    %c0_i32 = arith.constant 0 : i32
    %c0_i32_0 = arith.constant 0 : i32
    %c0_i32_1 = arith.constant 0 : i32
    return %c0_i32, %c0_i32_0 : i32, i32
  }
  func.func @transform_9(%arg0: i32) -> (i32, i32) {
    %c0_i32 = arith.constant 0 : i32
    %c0_i32_0 = arith.constant 0 : i32
    %c0_i32_1 = arith.constant 0 : i32
    return %c0_i32, %c0_i32_0 : i32, i32
  }
  func.func @transform_10(%arg0: i32) -> (i32, i32) {
    %c0_i32 = arith.constant 0 : i32
    %c0_i32_0 = arith.constant 0 : i32
    return %arg0, %c0_i32 : i32, i32
  }
}

</mosaic_0001>

<bundles_post_ra>
// kernel: lstmv2_forward.5
= control target key start
LH: loop header
LB: loop body
LE: loop exit
PB: predicated region body
PF: predicated region fallthrough
CT: control target
= control target key end

     0   :  { %s567_s0 = inlined_call_operand.vmem [shape: f32[2,8,64], index: 0, kind: input, shape index: {}]   ;;  %s568_s1 = inlined_call_operand.vmem [shape: bf16[64,6], index: 1, kind: input, shape index: {}]   ;;  %s569_s2 = inlined_call_operand.vmem [shape: f32[1,6], index: 2, kind: input, shape index: {}]   ;;  %s570_s3 = inlined_call_operand.vmem [shape: f32[1,6], index: 3, kind: input, shape index: {}]   ;;  %s571_s4 = inlined_call_operand.vmem [shape: f32[64,16], index: 4, kind: input, shape index: {}]   ;;  %s572_s5 = inlined_call_operand.vmem [shape: f32[1,16], index: 5, kind: input, shape index: {}]   ;;  %s573_s6 = inlined_call_operand.vmem [shape: f32[16,16], index: 6, kind: input, shape index: {}]   ;;  %s574_s7 = inlined_call_operand.vmem [shape: f32[1,16], index: 7, kind: input, shape index: {}]   ;;  %s575_s8 = inlined_call_operand.vmem [shape: f32[16,3], index: 8, kind: input, shape index: {}]   ;;  %s576_s9 = inlined_call_operand.vmem [shape: f32[1,3], index: 9, kind: input, shape index: {}]   ;;  %s577_s10 = inlined_call_operand.hbm [shape: f32[2,3], index: 10, kind: output, shape index: {}]  }
   0x1   :  { %v374_v0 = vld [vmem:[%s568_s1 + $0x18] sm:$0xff]  ;;  %v373_v1 = vld [vmem:[%s568_s1 + $0x10] sm:$0xff]  ;;  %v37_v2 = vld [vmem:[%s567_s0] sm:$0xff] }
   0x2   :  { %84 = vmatpush.bf16.msra.mxu0 %v374_v0  ;;  %v38_v3 = vld [vmem:[%s567_s0 + $0x8] sm:$0xff]  ;;  %192 = vmatpush.msra.mxu1 %v37_v2 }
   0x3   :  { %219 = vmatpush.msra.mxu2 %v38_v3 }
   0x4   :  { %15 = vsyncpa [#allocation3], 0  ;;  %v372_v4 = vld [vmem:[%s568_s1 + $0x8] sm:$0xff]  ;;  %v371_v5 = vld [vmem:[%s568_s1] sm:$0xff]  ;;  %v39_v6 = vpack.c.bf16 %v38_v3, %v37_v2  ;;  %vm76_vm0 = vcmask 523264   ;;  %vm102_vm1 = vcmask 48128   ;;  %v111_v20 = vlaneseq }
   0x5   :  { %v380_v7 = vld [vmem:[%s569_s2] ss:$0 sm:$0xff]  ;;  %vm115_vm2 = vcmask 1041409   ;;  %vm118_vm3 = vcmask 58368   ;;  %v423_v27 = vmov 0   ;;  %v231_v58 = vld [vmem:[%s571_s4 + $0x38] sm:$0xff] }
   0x6   :  { %85 = vmatpush.bf16.msra.mxu0 %v373_v1  ;;  %v381_v10 = vld [vmem:[%s570_s3] ss:$0 sm:$0xff]  ;;  %v505_v21 = vand.u32 127, %v111_v20  ;;  %378 = vset.pattern.permute.xlu2 %v423_v27  ;;  %v230_v59 = vld [vmem:[%s571_s4 + $0x30] sm:$0xff]  ;;  %v229_v60 = vld [vmem:[%s571_s4 + $0x28] sm:$0xff]  ;;  %vm174_vm8 = vcmask 64512  }
   0x7   :  { %377 = vset.pattern.permute.xlu1 %v423_v27  ;;  %379 = vset.pattern.permute.xlu0 %v423_v27  ;;  %v228_v1 = vld [vmem:[%s571_s4 + $0x20] sm:$0xff]  ;;  %v227_v2 = vld [vmem:[%s571_s4 + $0x18] sm:$0xff]  ;;  %v226_v3 = vld [vmem:[%s571_s4 + $0x10] sm:$0xff]  ;;  %vm271_vm10 = vcmask 130048   ;;  %vm331_vm12 = vcmask 17408  }
   0x8   :  { %250 = vmatpush.msra.mxu3 %v231_v58 }
   0xa   :  { %86 = vmatpush.bf16.msra.mxu0 %v372_v4  ;;  %251 = vmatpush.msra.mxu3 %v230_v59  ;;  %v225_v4 = vld [vmem:[%s571_s4 + $0x8] sm:$0xff] }
   0xc   :  { %252 = vmatpush.msra.mxu3 %v229_v60 }
   0xe   :  { %87 = vmatpush.bf16.msra.mxu0 %v371_v5  ;;  %253 = vmatpush.msra.mxu3 %v228_v1  ;;  %v224_v5 = vld [vmem:[%s571_s4] sm:$0xff] }
  0x10   :  { %254 = vmatpush.msra.mxu3 %v227_v2 }
  0x11   :  { %365 = vmatmul.msk.bf16.vlgmr.msra.gmra.mxu0 %vm76_vm0, %v39_v6  ;;  %v266_v6 = vld [vmem:[%s573_s6 + $0x8] sm:$0xff] }
  0x12   :  { %255 = vmatpush.msra.mxu3 %v226_v3  ;;  %289 = vmatpush.msrb.mxu1 %v266_v6 }
  0x14   :  { %256 = vmatpush.msra.mxu3 %v225_v4 }
  0x16   :  { %257 = vmatpush.msra.mxu3 %v224_v5 }
  0x8e   :  { %v89_v8 = vpop.f32.mrf.mxu0 }
  0x8f   :  { %v90_v9 = vadd.f32 %v380_v7, %v89_v8 }
  0x91   :  { %385 = vtanh.f32 %v90_v9 }
  0x96   :  { %v91_v11 = vpop.f32.mrf.mxu0 }
  0x97   :  { %v386_v12 = vpop.eup %385  ;;  %v92_v13 = vadd.f32 %v380_v7, %v91_v11  ;;  %v265_v11 = vld [vmem:[%s573_s6] sm:$0xff] }
  0x98   :  { %v100_v14 = vmul.f32 %v386_v12, %v381_v10  ;;  %290 = vmatpush.msrb.mxu1 %v265_v11  ;;  %v299_v12 = vld [vmem:[%s575_s8 + $0x8] sm:$0xff] }
  0x99   :  { %387 = vtanh.f32 %v92_v13  ;;  %321 = vmatpush.msrb.mxu2 %v299_v12  ;;  %v382_v13 = vld [vmem:[%s572_s5] ss:$0 sm:$0xff] }
  0x9a   :  { %v103_v15 = vsel %vm102_vm1, %v100_v14, 0.0 }
  0x9b   :  { %104 = vadd.xlane.f32.xlu0 %v103_v15 }
  0x9f   :  { %v388_v16 = vpop.eup %387 }
  0xa0   :  { %v101_v17 = vmul.f32 %v388_v16, %v381_v10 }
  0xa2   :  { %v106_v18 = vsel %vm102_vm1, %v101_v17, 0.0 }
  0xa3   :  { %107 = vadd.xlane.f32.xlu0 %v106_v18  ;;  %v298_v18 = vld [vmem:[%s575_s8] sm:$0xff]  ;;  %s424_s8 = smov [#allocation2]  }
  0xa4   :  { %322 = vmatpush.msrb.mxu2 %v298_v18  ;;  %s338_s28 = sshll.u32 %s424_s8, 4  ;;  %s339_s28 = int_to_ptr.vmem [resolvable:$true] %s338_s28 }
 0x10e   :  { %v105_v19 = vpop.xlane.xlu0 %104 }
 0x10f   :  { %v113_v23 = vperm.slane %v105_v19, %v505_v21 }
 0x116   :  { %v108_v22 = vpop.xlane.xlu0 %107 }
 0x117   :  { %v114_v24 = vperm.slane %v108_v22, %v505_v21 }
 0x119   :  { %v116_v25 = vsel %vm115_vm2, %v114_v24, %v113_v23  ;;  %v384_v24 = vld [vmem:[%s576_s9] ss:$0 sm:$0xff] }
 0x11a   :  { %v119_v26 = vsel %vm118_vm3, %v116_v25, -inf }
 0x11b   :  { %120 = vmax.xlane.f32.xlu1 %v119_v26 }
 0x18e   :  { %v121_v28 = vpop.xlane.xlu1 %120 }
 0x18f   :  { %v123_v29 = vperm.slane %v121_v28, 0  ;;  %v124_v30 = vperm.slane %v121_v28, 1 }
 0x191   :  { %v127_v31 = vsub.f32 %v105_v19, %v123_v29  ;;  %v128_v32 = vsub.f32 %v108_v22, %v124_v30  ;;  %v383_v19 = vld [vmem:[%s574_s7] ss:$0 sm:$0xff]  ;;  %s340_s7 = sshll.u32 %s577_s10, 4  ;;  %s341_s7 = int_to_ptr.hbm [resolvable:$true] %s340_s7 }
 0x193   :  { %v129_v33 = vmul.f32 1.442695, %v127_v31  ;;  %v131_v34 = vmul.f32 1.442695, %v128_v32 }
 0x195   :  { %389 = vpow2.f32 %v129_v33 }
 0x196   :  { %391 = vpow2.f32 %v131_v34 }
 0x19b   :  { %v390_v35 = vpop.eup %389 }
 0x19c   :  { %v392_v36 = vpop.eup %391  ;;  %136 = vperm.xlu1 %377, %v390_v35  }
 0x19d   :  { %139 = vperm.xlu2 %378, %v392_v36  }
 0x1f7   :  { %v140_v37 = vpop.permute.xlu2 %139 }
 0x1f8   :  { %v142_v39 = vperm.slane %v140_v37, %v505_v21 }
 0x20e   :  { %v137_v38 = vpop.permute.xlu1 %136 }
 0x20f   :  { %v141_v40 = vperm.slane %v137_v38, %v505_v21 }
 0x211   :  { %v143_v41 = vsel %vm115_vm2, %v142_v39, %v141_v40 }
 0x212   :  { %v145_v42 = vsel %vm118_vm3, %v143_v41, 0.0 }
 0x213   :  { %146 = vadd.xlane.f32.xlu2 %v145_v42 }
 0x286   :  { %v147_v43 = vpop.xlane.xlu2 %146 }
 0x287   :  { %393 = vrcp.f32 %v147_v43  ;;  %v159_v47 = vand.u32 2147483648, %v147_v43  ;;  %v157_v49 = vand.u32 2147483647, %v147_v43  ;;  %vm153_vm5 = vweird.f32 %v147_v43 }
 0x289   :  { %v160_v51 = vor.u32 1.1754944e-38, %v159_v47  ;;  %vm158_vm7 = vcmp.eq.f32.partialorder %v157_v49, 8.507059e+37 }
 0x28d   :  { %v394_v44 = vpop.eup %393 }
 0x28e   :  { %v149_v45 = vmul.f32 %v394_v44, %v147_v43  ;;  %vm154_vm4 = vweird.f32 %v394_v44 }
 0x28f   :  { %vm155_vm6 = vmor %vm153_vm5, %vm154_vm4 }
 0x290   :  { %v150_v46 = vsub.f32 1.0, %v149_v45 }
 0x292   :  { %v151_v48 = vmul.f32 %v394_v44, %v150_v46 }
 0x294   :  { %v152_v50 = vadd.f32 %v394_v44, %v151_v48 }
 0x296   :  { %v156_v52 = vsel %vm155_vm6, %v394_v44, %v152_v50 }
 0x297   :  { %v161_v53 = vsel %vm158_vm7, %v160_v51, %v156_v52 }
 0x298   :  { %v164_v54 = vperm.slane %v161_v53, 1  ;;  %v163_v55 = vperm.slane %v161_v53, 0 }
 0x29a   :  { %v168_v56 = vmul.f32 %v392_v36, %v164_v54  ;;  %v167_v57 = vmul.f32 %v390_v35, %v163_v55 }
 0x29c   :  { %199 = vperm.xlu0 %379, %v168_v56   ;;  %171 = vperm.xlu1 %377, %v167_v57  }
 0x30e   :  { %v200_v61 = vpop.permute.xlu0 %199  ;;  %v172_v62 = vpop.permute.xlu1 %171 }
 0x30f   :  { %v201_v63 = vperm.slane %v200_v61, %v505_v21  ;;  %v173_v0 = vperm.slane %v172_v62, %v505_v21 }
 0x311   :  { %366 = vmatmul.msk.f32.vlgmr.msra.gmra.mxu1 %vm174_vm8, %v173_v0  ;;  %367 = vmatmul.msk.f32.vlgmr.msra.gmra.mxu2 %vm174_vm8, %v201_v63 }
 0x38e   :  { %v194_v9 = vpop.f32.mrf.mxu1 }
 0x394   :  { %v221_v7 = vpop.f32.mrf.mxu2 }
 0x395   :  { %v238_v8 = vrot.slane %v221_v7, 7 }
 0x397   :  { %v239_v10 = vsel %vm115_vm2, %v238_v8, %v194_v9 }
 0x398   :  { %368 = vmatmul.msk.f32.vlgmr.msra.gmra.mxu3 %vm76_vm0, %v239_v10 }
 0x41b   :  { %v259_v14 = vpop.f32.mrf.mxu3 }
 0x41c   :  { %v260_v15 = vadd.f32 %v382_v13, %v259_v14 }
 0x41e   :  { %vm262_vm9 = vcmp.ge.f32.partialorder %v260_v15, 0.0  ;;  %v263_v16 = vmul.f32 0.01, %v260_v15 }
 0x420   :  { %v264_v17 = vsel %vm262_vm9, %v260_v15, %v263_v16 }
 0x421   :  { %369 = vmatmul.msk.f32.vlgmr.msrb.gmra.mxu1 %vm271_vm10, %v264_v17 }
 0x49e   :  { %v292_v20 = vpop.f32.mrf.mxu1 }
 0x49f   :  { %v293_v21 = vadd.f32 %v383_v19, %v292_v20 }
 0x4a1   :  { %vm295_vm11 = vcmp.ge.f32.partialorder %v293_v21, 0.0  ;;  %v296_v22 = vmul.f32 0.01, %v293_v21 }
 0x4a3   :  { %v297_v23 = vsel %vm295_vm11, %v293_v21, %v296_v22 }
 0x4a4   :  { %370 = vmatmul.msk.f32.vlgmr.msrb.gmra.mxu2 %vm271_vm10, %v297_v23 }
 0x527   :  { %v324_v25 = vpop.f32.mrf.mxu2 }
 0x528   :  { %v325_v26 = vadd.f32 %v384_v24, %v324_v25 }
 0x52a   :  { %v327_v27 = vmul.f32 0.5, %v325_v26 }
 0x52c   :  { %395 = vtanh.f32 %v327_v27 }
 0x532   :  { %v396_v28 = vpop.eup %395 }
 0x533   :  { %v329_v29 = vadd.f32 1.0, %v396_v28 }
 0x535   :  { %v330_v30 = vmul.f32 0.5, %v329_v29 }
 0x537   :  { %332 = vst.msk [vmem:[#allocation2] sm:$0x3] %vm331_vm12, %v330_v30 }
 0x538   :  { %343 = dma.vmem_to_hbm [thread:$0]  %s339_s28, 32, %s341_s7, [#allocation3]  }
 0x539   :  { %421 = dma.done.wait [#allocation3], 32  }
 0x53a   :  { %422 = vsyncadd [#allocation3], 4294967264 }
 0x53b   :  { %348 = vsyncpa [#allocation3], 1 }

// kernel: lstmv2_forward.3
= control target key start
LH: loop header
LB: loop body
LE: loop exit
PB: predicated region body
PF: predicated region fallthrough
CT: control target
= control target key end

     0   :  { %s1059_s9 = smov 0   ;;  %s1061_s10 = smov 0   ;;  %s1254_s0 = inlined_call_operand.vmem [shape: f32[2,8,2,128], index: 0, kind: input, shape index: {}]   ;;  %s1255_s1 = inlined_call_operand.vmem [shape: bf16[2,32,128], index: 1, kind: input, shape index: {}]   ;;  %s1256_s2 = inlined_call_operand.vmem [shape: f32[2,8,2,32], index: 2, kind: output, shape index: {}]  }
   0x1   :  { %s1063_s11 = smov 0  }
   0x2 LB: > { %s24_s12 = sadd.s32 1, %s1034_s10  ;;  %p884_p0 = scmp.ge.s32.totalorder %s1038_s11, 1  ;;  %s1038_s11 = sphi %s1063_s11, %s12_s11   ;;  %s1034_s10 = sphi %s1061_s10, %s1258_s10   ;;  %s1030_s9 = sphi %s1059_s9, %s1257_s9  }
   0x3   : > { %p26_p1 = scmp.ge.s32.totalorder %s24_s12, 2  ;;  %p167_p2 = scmp.lt.s32.totalorder %s1038_s11, 3 }
   0x5   : > { %s1260_s12 = smov (%p26_p1, %s24_s12), 0  ;;  %p168_p3 = pnand %p884_p0, %p167_p2 }
   0x6   : > { %p215_p4 = scmp.lt.s32.totalorder (!%p168_p3), %s1030_s9, 1  ;;  %s891_s18 = smul.u32 (!%p168_p3), 14, %s1030_s9 }
   0x7   : > { %171 = sbr.rel (%p168_p3) target bundleno = 4688 (0x1250), region = 28  ;;  %s1041_s23 = smov (!%p168_p3), 64  }
   0x8   : > { %s1042_s24 = smov (!%p168_p3), 32   ;;  %s901_s25 = smul.u32 (!%p168_p3), 10, %s1030_s9 }
   0x9   : > { %s906_s27 = smul.u32 (!%p168_p3), 6, %s1030_s9  ;;  %s911_s29 = sshll.u32 (!%p168_p3), %s1030_s9, 1 }
   0xa   : > { %s494_s3 = ssub.s32 (!%p168_p3), 4, %s1030_s9  ;;  %s918_s6 = smul.u32 (!%p168_p3), 4294967290, %s1030_s9 }
   0xb   : > { %s1150_s4 = sshll.u32 (!%p168_p3), %s494_s3, 1  ;;  %s923_s8 = smul.u32 (!%p168_p3), 4294967286, %s1030_s9 }
   0xc   : > { %vm256_vm0 = vcmask 254976   ;;  %v1040_v0 = vmov 0.0   ;;  %s216_s13 = scalar_select %p215_p4, %s1030_s9, 1  ;;  %vm282_vm1 = vcmask 261120  }
   0xd   : > { %257 = vst.msk [vmem:[#allocation2] sm:$0x3] %vm256_vm0, %v1040_v0  ;;  %s928_s15 = smul.u32 4294967282, %s1030_s9 }
   0xe   : > { %258 = vst.msk [vmem:[#allocation3] sm:$0x3] %vm256_vm0, %v1040_v0  ;;  %s1083_s14 = sshll.u32 %s216_s13, 4 }
   0xf   : > { %s232_s17 = scalar_lea.vmem %s1255_s1, %s1083_s14  ;;  %s1095_s21 = scalar_lea.vmem %s1254_s0, %s1083_s14 }
  0x10   : > { %v939_v1 = vld [vmem:[%s232_s17 + $0x8] sm:$0xff]  ;;  %v938_v2 = vld [vmem:[%s232_s17] sm:$0xff]  ;;  %s267_s22 = scalar_lea.vmem %s1095_s21, %s891_s18  ;;  %s789_s26 = scalar_lea.vmem %s1095_s21, %s901_s25 }
  0x11   : > { %292 = vmatpush.bf16.msra.mxu0 %v939_v1  ;;  %351 = vmatpush.bf16.msra.mxu1 %v939_v1  ;;  %v268_v5 = vld [vmem:[%s267_s22] sm:$0x3]  ;;  %v902_v26 = vld [vmem:[%s789_s26 + $0x2] sm:$0x3]  ;;  %s797_s28 = scalar_lea.vmem %s1095_s21, %s906_s27  ;;  %s804_s30 = scalar_lea.vmem %s1095_s21, %s911_s29 }
  0x12   : > { %405 = vmatpush.bf16.msra.mxu2 %v939_v1  ;;  %458 = vmatpush.bf16.msra.mxu3 %v939_v1  ;;  %v907_v45 = vld [vmem:[%s797_s28 + $0x4] sm:$0x3]  ;;  %v912_v0 = vld [vmem:[%s804_s30 + $0x6] sm:$0x3]  ;;  %s496_s5 = scalar_lea.vmem %s1095_s21, %s1150_s4  ;;  %s815_s7 = scalar_lea.vmem %s1095_s21, %s918_s6 }
  0x13   : > { %s823_s13 = scalar_lea.vmem %s1095_s21, %s923_s8  ;;  %s831_s16 = scalar_lea.vmem %s1095_s21, %s928_s15 }
  0x14   : > { %v263_v3 = vld [vmem:[#allocation2] sm:$0x3]  ;;  %s1199_s20 = scalar_lea.vmem %s1256_s2, %s1083_s14 }
  0x15   : > { %v269_v4 = vpack.c.bf16 %v263_v3, %v263_v3  ;;  %293 = vmatpush.bf16.msra.mxu0 %v938_v2  ;;  %352 = vmatpush.bf16.msra.mxu1 %v938_v2  ;;  %v264_v10 = vld [vmem:[#allocation3] sm:$0x3]  ;;  %s330_s21 = scalar_lea.vmem %s1199_s20, %s891_s18  ;;  %s793_s14 = scalar_lea.vmem %s1199_s20, %s901_s25 }
  0x16   : > { %406 = vmatpush.bf16.msra.mxu2 %v938_v2  ;;  %459 = vmatpush.bf16.msra.mxu3 %v938_v2  ;;  %s1043_s18 = smov 96   ;;  %s801_s22 = scalar_lea.vmem %s1199_s20, %s906_s27 }
  0x17   : > { %s545_s25 = scalar_lea.vmem %s1199_s20, %s1150_s4  ;;  %s819_s26 = scalar_lea.vmem %s1199_s20, %s918_s6 }
  0x18   : > { %900 = vmatmul.msk.bf16.vlgmr.msra.gmra.mxu0 %vm282_vm1, %v269_v4  ;;  %s835_s27 = scalar_lea.vmem %s1199_s20, %s928_s15 }
  0x19   : > { %511 = vmatpush.bf16.msrb.mxu0 %v939_v1  ;;  %565 = vmatpush.bf16.msrb.mxu1 %v939_v1 }
  0x1a   : > { %619 = vmatpush.bf16.msrb.mxu2 %v939_v1  ;;  %673 = vmatpush.bf16.msrb.mxu3 %v939_v1 }
  0x1d   : > { %512 = vmatpush.bf16.msrb.mxu0 %v938_v2  ;;  %566 = vmatpush.bf16.msrb.mxu1 %v938_v2 }
  0x1e   : > { %620 = vmatpush.bf16.msrb.mxu2 %v938_v2  ;;  %674 = vmatpush.bf16.msrb.mxu3 %v938_v2 }
  0x95   : > { %v295_v6 = vpop.f32.mrf.mxu0 }
  0x96   : > { %v299_v7 = vadd.f32 %v295_v6, %v268_v5 }
  0x98   : > { %968 = vtanh.f32 %v299_v7  ;;  %v300_v11 = vmul.f32 0.5, %v299_v7 }
  0x9a   : > { %970 = vtanh.f32 %v300_v11 }
  0x9d   : > { %v297_v8 = vpop.f32.mrf.mxu0 }
  0x9e   : > { %v969_v9 = vpop.eup %968 }
  0x9f   : > { %311 = vrot.lane.b32.xlu0 %v969_v9, %s1041_s23 }
  0xa0   : > { %v971_v12 = vpop.eup %970 }
  0xa1   : > { %v302_v13 = vadd.f32 1.0, %v971_v12 }
  0xa3   : > { %v303_v14 = vmul.f32 0.5, %v302_v13 }
  0xa7   : > { %306 = vrot.lane.b32.xlu0 %v264_v10, %s1042_s24 }
 0x111   : > { %v312_v15 = vpop.permute.xlu0 %311 }
 0x112   : > { %v314_v16 = vmul.f32 %v312_v15, %v303_v14 }
 0x114   : > { %316 = vrot.lane.b32.xlu1 %v314_v16, %s1042_s24 }
 0x119   : > { %v307_v17 = vpop.permute.xlu0 %306 }
 0x11a   : > { %v309_v18 = vmul.f32 %v307_v17, %v303_v14 }
 0x186   : > { %v317_v19 = vpop.permute.xlu1 %316 }
 0x187   : > { %v319_v20 = vadd.f32 %v317_v19, %v309_v18  ;;  %v497_v19 = vld [vmem:[%s496_s5] sm:$0x3] }
 0x189   : > { %972 = vtanh.f32 %v319_v20 }
 0x18f   : > { %v973_v21 = vpop.eup %972 }
 0x190   : > { %322 = vrot.lane.b32.xlu1 %v973_v21, %s1041_s23 }
 0x202   : > { %v323_v22 = vpop.permute.xlu1 %322 }
 0x203   : > { %v1104_v23 = vmul.f32 %v323_v22, %v303_v14 }
 0x205   : > { %v338_v24 = vpack.c.bf16 %v1104_v23, %v1104_v23 }
 0x207   : > { %340 = vrot.lane.b32.xlu2 %v338_v24, %s1042_s24 }
 0x261   : > { %v341_v25 = vpop.permute.xlu2 %340 }
 0x262   : > { %903 = vmatmul.msk.bf16.vlgmr.msra.gmra.mxu1 %vm282_vm1, %v341_v25 }
 0x2df   : > { %v354_v27 = vpop.f32.mrf.mxu1 }
 0x2e0   : > { %v358_v28 = vadd.f32 %v902_v26, %v354_v27 }
 0x2e2   : > { %974 = vtanh.f32 %v358_v28  ;;  %v359_v31 = vmul.f32 0.5, %v358_v28 }
 0x2e4   : > { %976 = vtanh.f32 %v359_v31 }
 0x2e7   : > { %v356_v29 = vpop.f32.mrf.mxu1 }
 0x2e8   : > { %v975_v30 = vpop.eup %974 }
 0x2e9   : > { %366 = vrot.lane.b32.xlu2 %v975_v30, %s1041_s23 }
 0x2ea   : > { %v977_v32 = vpop.eup %976 }
 0x2eb   : > { %v361_v33 = vadd.f32 1.0, %v977_v32 }
 0x2ed   : > { %v362_v34 = vmul.f32 0.5, %v361_v33 }
 0x2ef   : > { %v364_v37 = vmul.f32 %v362_v34, %v319_v20 }
 0x343   : > { %v367_v35 = vpop.permute.xlu2 %366 }
 0x344   : > { %v369_v36 = vmul.f32 %v367_v35, %v362_v34 }
 0x346   : > { %371 = vrot.lane.b32.xlu0 %v369_v36, %s1042_s24 }
 0x3b8   : > { %v372_v38 = vpop.permute.xlu0 %371 }
 0x3b9   : > { %v374_v39 = vadd.f32 %v372_v38, %v364_v37 }
 0x3bb   : > { %978 = vtanh.f32 %v374_v39 }
 0x3c1   : > { %v979_v40 = vpop.eup %978 }
 0x3c2   : > { %377 = vrot.lane.b32.xlu1 %v979_v40, %s1041_s23 }
 0x434   : > { %v378_v41 = vpop.permute.xlu1 %377 }
 0x435   : > { %v1117_v42 = vmul.f32 %v378_v41, %v362_v34 }
 0x437   : > { %v392_v43 = vpack.c.bf16 %v1117_v42, %v1117_v42 }
 0x439   : > { %394 = vrot.lane.b32.xlu2 %v392_v43, %s1042_s24 }
 0x493   : > { %v395_v44 = vpop.permute.xlu2 %394 }
 0x494   : > { %908 = vmatmul.msk.bf16.vlgmr.msra.gmra.mxu2 %vm282_vm1, %v395_v44 }
 0x517   : > { %v408_v46 = vpop.f32.mrf.mxu2 }
 0x518   : > { %v412_v47 = vadd.f32 %v907_v45, %v408_v46 }
 0x51a   : > { %980 = vtanh.f32 %v412_v47  ;;  %v413_v50 = vmul.f32 0.5, %v412_v47 }
 0x51c   : > { %982 = vtanh.f32 %v413_v50 }
 0x51f   : > { %v410_v48 = vpop.f32.mrf.mxu2 }
 0x520   : > { %v981_v49 = vpop.eup %980 }
 0x521   : > { %420 = vrot.lane.b32.xlu0 %v981_v49, %s1041_s23 }
 0x522   : > { %v983_v51 = vpop.eup %982 }
 0x523   : > { %v415_v52 = vadd.f32 1.0, %v983_v51 }
 0x525   : > { %v416_v53 = vmul.f32 0.5, %v415_v52 }
 0x527   : > { %v418_v56 = vmul.f32 %v416_v53, %v374_v39  ;;  %v919_v39 = vld [vmem:[%s815_s7 + $0xa] sm:$0x3] }
 0x593   : > { %v421_v54 = vpop.permute.xlu0 %420 }
 0x594   : > { %v423_v55 = vmul.f32 %v421_v54, %v416_v53 }
 0x596   : > { %425 = vrot.lane.b32.xlu1 %v423_v55, %s1042_s24 }
 0x608   : > { %v426_v57 = vpop.permute.xlu1 %425 }
 0x609   : > { %v428_v58 = vadd.f32 %v426_v57, %v418_v56 }
 0x60b   : > { %984 = vtanh.f32 %v428_v58 }
 0x611   : > { %v985_v59 = vpop.eup %984 }
 0x612   : > { %431 = vrot.lane.b32.xlu2 %v985_v59, %s1041_s23  ;;  %v924_v59 = vld [vmem:[%s823_s13 + $0xc] sm:$0x3] }
 0x66c   : > { %v432_v60 = vpop.permute.xlu2 %431 }
 0x66d   : > { %v1130_v61 = vmul.f32 %v432_v60, %v416_v53 }
 0x66f   : > { %v445_v62 = vpack.c.bf16 %v1130_v61, %v1130_v61 }
 0x671   : > { %447 = vrot.lane.b32.xlu0 %v445_v62, %s1042_s24 }
 0x6e3   : > { %v448_v63 = vpop.permute.xlu0 %447 }
 0x6e4   : > { %913 = vmatmul.msk.bf16.vlgmr.msra.gmra.mxu3 %vm282_vm1, %v448_v63 }
 0x767   : > { %v461_v1 = vpop.f32.mrf.mxu3 }
 0x768   : > { %v465_v2 = vadd.f32 %v912_v0, %v461_v1 }
 0x76a   : > { %986 = vtanh.f32 %v465_v2  ;;  %v466_v5 = vmul.f32 0.5, %v465_v2 }
 0x76c   : > { %988 = vtanh.f32 %v466_v5 }
 0x76f   : > { %v463_v3 = vpop.f32.mrf.mxu3 }
 0x770   : > { %v987_v4 = vpop.eup %986 }
 0x771   : > { %473 = vrot.lane.b32.xlu1 %v987_v4, %s1041_s23 }
 0x772   : > { %v989_v6 = vpop.eup %988 }
 0x773   : > { %v468_v7 = vadd.f32 1.0, %v989_v6 }
 0x775   : > { %v469_v8 = vmul.f32 0.5, %v468_v7 }
 0x777   : > { %v471_v11 = vmul.f32 %v469_v8, %v428_v58 }
 0x7e3   : > { %v474_v9 = vpop.permute.xlu1 %473 }
 0x7e4   : > { %v476_v10 = vmul.f32 %v474_v9, %v469_v8 }
 0x7e6   : > { %478 = vrot.lane.b32.xlu2 %v476_v10, %s1042_s24 }
 0x840   : > { %v479_v12 = vpop.permute.xlu2 %478 }
 0x841   : > { %v481_v13 = vadd.f32 %v479_v12, %v471_v11 }
 0x843   : > { %990 = vtanh.f32 %v481_v13 }
 0x849   : > { %v991_v14 = vpop.eup %990 }
 0x84a   : > { %484 = vrot.lane.b32.xlu0 %v991_v14, %s1041_s23 }
 0x8bc   : > { %v485_v15 = vpop.permute.xlu0 %484 }
 0x8bd   : > { %v1143_v16 = vmul.f32 %v485_v15, %v469_v8  ;;  %v929_v15 = vld [vmem:[%s831_s16 + $0xe] sm:$0x3] }
 0x8bf   : > { %v498_v17 = vpack.c.bf16 %v1143_v16, %v1143_v16 }
 0x8c1   : > { %500 = vrot.lane.b32.xlu1 %v498_v17, %s1042_s24 }
 0x933   : > { %v501_v18 = vpop.permute.xlu1 %500 }
 0x934   : > { %917 = vmatmul.msk.bf16.vlgmr.msrb.gmra.mxu0 %vm282_vm1, %v501_v18 }
 0x9b1   : > { %v514_v20 = vpop.f32.mrf.mxu0 }
 0x9b2   : > { %v518_v21 = vadd.f32 %v514_v20, %v497_v19 }
 0x9b4   : > { %992 = vtanh.f32 %v518_v21  ;;  %v519_v25 = vmul.f32 0.5, %v518_v21 }
 0x9b6   : > { %994 = vtanh.f32 %v519_v25 }
 0x9b9   : > { %v516_v22 = vpop.f32.mrf.mxu0 }
 0x9ba   : > { %v993_v24 = vpop.eup %992 }
 0x9bb   : > { %526 = vrot.lane.b32.xlu2 %v993_v24, %s1041_s23 }
 0x9bc   : > { %v995_v26 = vpop.eup %994 }
 0x9bd   : > { %v521_v27 = vadd.f32 1.0, %v995_v26 }
 0x9bf   : > { %v522_v28 = vmul.f32 0.5, %v521_v27 }
 0x9c1   : > { %v524_v31 = vmul.f32 %v522_v28, %v481_v13 }
 0xa15   : > { %v527_v29 = vpop.permute.xlu2 %526 }
 0xa16   : > { %v529_v30 = vmul.f32 %v527_v29, %v522_v28 }
 0xa18   : > { %531 = vrot.lane.b32.xlu0 %v529_v30, %s1042_s24 }
 0xa8a   : > { %v532_v32 = vpop.permute.xlu0 %531 }
 0xa8b   : > { %v534_v33 = vadd.f32 %v532_v32, %v524_v31 }
 0xa8d   : > { %996 = vtanh.f32 %v534_v33 }
 0xa93   : > { %v997_v34 = vpop.eup %996 }
 0xa94   : > { %537 = vrot.lane.b32.xlu1 %v997_v34, %s1041_s23 }
 0xb06   : > { %v538_v35 = vpop.permute.xlu1 %537 }
 0xb07   : > { %v1157_v36 = vmul.f32 %v538_v35, %v522_v28 }
 0xb09   : > { %v552_v37 = vpack.c.bf16 %v1157_v36, %v1157_v36 }
 0xb0b   : > { %554 = vrot.lane.b32.xlu2 %v552_v37, %s1042_s24 }
 0xb65   : > { %v555_v38 = vpop.permute.xlu2 %554 }
 0xb66   : > { %920 = vmatmul.msk.bf16.vlgmr.msrb.gmra.mxu1 %vm282_vm1, %v555_v38 }
 0xbe3   : > { %v568_v40 = vpop.f32.mrf.mxu1 }
 0xbe4   : > { %v572_v41 = vadd.f32 %v919_v39, %v568_v40 }
 0xbe6   : > { %998 = vtanh.f32 %v572_v41  ;;  %v573_v45 = vmul.f32 0.5, %v572_v41 }
 0xbe8   : > { %1000 = vtanh.f32 %v573_v45 }
 0xbeb   : > { %v570_v43 = vpop.f32.mrf.mxu1 }
 0xbec   : > { %v999_v44 = vpop.eup %998 }
 0xbed   : > { %580 = vrot.lane.b32.xlu0 %v999_v44, %s1041_s23 }
 0xbee   : > { %v1001_v46 = vpop.eup %1000 }
 0xbef   : > { %v575_v47 = vadd.f32 1.0, %v1001_v46 }
 0xbf1   : > { %v576_v48 = vmul.f32 0.5, %v575_v47 }
 0xbf3   : > { %v578_v51 = vmul.f32 %v576_v48, %v534_v33 }
 0xc5f   : > { %v581_v49 = vpop.permute.xlu0 %580 }
 0xc60   : > { %v583_v50 = vmul.f32 %v581_v49, %v576_v48 }
 0xc62   : > { %585 = vrot.lane.b32.xlu1 %v583_v50, %s1042_s24 }
 0xcd4   : > { %v586_v52 = vpop.permute.xlu1 %585 }
 0xcd5   : > { %v588_v53 = vadd.f32 %v586_v52, %v578_v51 }
 0xcd7   : > { %1002 = vtanh.f32 %v588_v53 }
 0xcdd   : > { %v1003_v54 = vpop.eup %1002 }
 0xcde   : > { %591 = vrot.lane.b32.xlu2 %v1003_v54, %s1041_s23 }
 0xd38   : > { %v592_v55 = vpop.permute.xlu2 %591 }
 0xd39   : > { %v1170_v56 = vmul.f32 %v592_v55, %v576_v48 }
 0xd3b   : > { %v606_v57 = vpack.c.bf16 %v1170_v56, %v1170_v56 }
 0xd3d   : > { %608 = vrot.lane.b32.xlu0 %v606_v57, %s1042_s24 }
 0xdaf   : > { %v609_v58 = vpop.permute.xlu0 %608 }
 0xdb0   : > { %925 = vmatmul.msk.bf16.vlgmr.msrb.gmra.mxu2 %vm282_vm1, %v609_v58 }
 0xe33   : > { %v622_v60 = vpop.f32.mrf.mxu2 }
 0xe34   : > { %v626_v62 = vadd.f32 %v924_v59, %v622_v60 }
 0xe36   : > { %1004 = vtanh.f32 %v626_v62  ;;  %v627_v1 = vmul.f32 0.5, %v626_v62 }
 0xe38   : > { %1006 = vtanh.f32 %v627_v1 }
 0xe3b   : > { %v624_v63 = vpop.f32.mrf.mxu2 }
 0xe3c   : > { %v1005_v0 = vpop.eup %1004 }
 0xe3d   : > { %634 = vrot.lane.b32.xlu1 %v1005_v0, %s1041_s23 }
 0xe3e   : > { %v1007_v2 = vpop.eup %1006 }
 0xe3f   : > { %v629_v3 = vadd.f32 1.0, %v1007_v2 }
 0xe41   : > { %v630_v4 = vmul.f32 0.5, %v629_v3 }
 0xe43   : > { %v632_v7 = vmul.f32 %v630_v4, %v588_v53 }
 0xeaf   : > { %v635_v5 = vpop.permute.xlu1 %634 }
 0xeb0   : > { %v637_v6 = vmul.f32 %v635_v5, %v630_v4 }
 0xeb2   : > { %639 = vrot.lane.b32.xlu2 %v637_v6, %s1042_s24 }
 0xf0c   : > { %v640_v8 = vpop.permute.xlu2 %639 }
 0xf0d   : > { %v642_v9 = vadd.f32 %v640_v8, %v632_v7 }
 0xf0f   : > { %1008 = vtanh.f32 %v642_v9 }
 0xf15   : > { %v1009_v10 = vpop.eup %1008 }
 0xf16   : > { %645 = vrot.lane.b32.xlu0 %v1009_v10, %s1041_s23 }
 0xf88   : > { %v646_v11 = vpop.permute.xlu0 %645 }
 0xf89   : > { %v648_v12 = vmul.f32 %v646_v11, %v630_v4 }
 0xf8b   : > { %v660_v13 = vpack.c.bf16 %v648_v12, %v648_v12 }
 0xf8d   : > { %662 = vrot.lane.b32.xlu1 %v660_v13, %s1042_s24 }
 0xfff   : > { %v663_v14 = vpop.permute.xlu1 %662 }
0x1000   : > { %930 = vmatmul.msk.bf16.vlgmr.msrb.gmra.mxu3 %vm282_vm1, %v663_v14 }
0x1083   : > { %v676_v17 = vpop.f32.mrf.mxu3 }
0x1084   : > { %v680_v18 = vadd.f32 %v929_v15, %v676_v17 }
0x1086   : > { %1010 = vtanh.f32 %v680_v18  ;;  %v681_v21 = vmul.f32 0.5, %v680_v18 }
0x1088   : > { %1012 = vtanh.f32 %v681_v21 }
0x108b   : > { %v678_v19 = vpop.f32.mrf.mxu3 }
0x108c   : > { %v1011_v20 = vpop.eup %1010 }
0x108d   : > { %688 = vrot.lane.b32.xlu2 %v1011_v20, %s1041_s23 }
0x108e   : > { %v1013_v22 = vpop.eup %1012 }
0x108f   : > { %v683_v24 = vadd.f32 1.0, %v1013_v22 }
0x1091   : > { %v684_v25 = vmul.f32 0.5, %v683_v24 }
0x1095   : > { %327 = vrot.lane.b32.xlu2 %v1104_v23, %s1042_s24 }
0x109d   : > { %489 = vrot.lane.b32.xlu2 %v1143_v16, %s1042_s24  ;;  %v686_v16 = vmul.f32 %v684_v25, %v642_v9 }
0x10a5   : > { %650 = vrot.lane.b32.xlu2 %v648_v12, %s1042_s24 }
0x10e7   : > { %v689_v26 = vpop.permute.xlu2 %688 }
0x10e8   : > { %v691_v27 = vmul.f32 %v689_v26, %v684_v25 }
0x10ea   : > { %693 = vrot.lane.b32.xlu0 %v691_v27, %s1042_s24 }
0x10ef   : > { %v328_v23 = vpop.permute.xlu2 %327 }
0x10f0   : > { %332 = vst.msk [vmem:[%s330_s21] sm:$0x3] %vm256_vm0, %v328_v23 }
0x10f2   : > { %382 = vrot.lane.b32.xlu0 %v1117_v42, %s1042_s24 }
0x10fa   : > { %542 = vrot.lane.b32.xlu0 %v1157_v36, %s1042_s24 }
0x115c   : > { %v694_v28 = vpop.permute.xlu0 %693 }
0x115d   : > { %v696_v29 = vadd.f32 %v694_v28, %v686_v16 }
0x115f   : > { %1014 = vtanh.f32 %v696_v29 }
0x1164   : > { %v383_v30 = vpop.permute.xlu0 %382 }
0x1165   : > { %v1015_v31 = vpop.eup %1014  ;;  %905 = vst.msk [vmem:[%s793_s14 + $0x2] sm:$0x3] %vm256_vm0, %v383_v30 }
0x1166   : > { %699 = vrot.lane.b32.xlu1 %v1015_v31, %s1041_s23  ;;  %s807_s23 = scalar_lea.vmem %s1199_s20, %s911_s29 }
0x116c   : > { %v543_v34 = vpop.permute.xlu0 %542 }
0x116e   : > { %436 = vrot.lane.b32.xlu1 %v1130_v61, %s1042_s24  ;;  %v490_v61 = vpop.permute.xlu2 %489 }
0x1176   : > { %596 = vrot.lane.b32.xlu1 %v1170_v56, %s1042_s24  ;;  %v651_v36 = vpop.permute.xlu2 %650 }
0x117e   : > { %711 = vrot.lane.b32.xlu1 %v696_v29, %s1043_s18 }
0x11d8   : > { %v700_v42 = vpop.permute.xlu1 %699 }
0x11d9   : > { %v702_v32 = vmul.f32 %v700_v42, %v684_v25 }
0x11db   : > { %704 = vrot.lane.b32.xlu0 %v702_v32, %s1042_s24  ;;  %s827_s24 = scalar_lea.vmem %s1199_s20, %s923_s8 }
0x11e0   : > { %v437_v33 = vpop.permute.xlu1 %436 }
0x11e1   : > { %910 = vst.msk [vmem:[%s801_s22 + $0x4] sm:$0x3] %vm256_vm0, %v437_v33 }
0x11e2   : > { %915 = vst.msk [vmem:[%s807_s23 + $0x6] sm:$0x3] %vm256_vm0, %v490_v61 }
0x11e3   : > { %546 = vst.msk [vmem:[%s545_s25] sm:$0x3] %vm256_vm0, %v543_v34 }
0x11e8   : > { %v597_v35 = vpop.permute.xlu1 %596 }
0x11e9   : > { %922 = vst.msk [vmem:[%s819_s26 + $0xa] sm:$0x3] %vm256_vm0, %v597_v35 }
0x11ea   : > { %927 = vst.msk [vmem:[%s827_s24 + $0xc] sm:$0x3] %vm256_vm0, %v651_v36 }
0x11f0   : > { %v712_v37 = vpop.permute.xlu1 %711 }
0x11f1   : > { %714 = vst.msk [vmem:[#allocation3] sm:$0x3] %vm256_vm0, %v712_v37 }
0x124d   : > { %v705_v38 = vpop.permute.xlu0 %704 }
0x124e   : > { %932 = vst.msk [vmem:[%s835_s27 + $0xe] sm:$0x3] %vm256_vm0, %v705_v38 }
0x124f   : > { %709 = vst.msk [vmem:[#allocation2] sm:$0x3] %vm256_vm0, %v705_v38 }
0x1250 PF: > { %s12_s11 = sadd.s32 1, %s1038_s11   ;;  %s1257_s9 = smov %s1034_s10 }
0x1251   : > { %p9_p5 = scmp.ge.s32.totalorder %s12_s11, 4   ;;  %s1258_s10 = smov %s1260_s12 }
0x1253   :  { %11 = sbr.rel (!%p9_p5) target bundleno = 2 (0x2), region = 81 }

</bundles_post_ra>
